<compile_context>
chip_gen: v6e
topology: v6e:2x2x1
jax: 0.10.0
libtpu: 0.0.40
codegen_flags: <defaults>
</compile_context>

<pallas_src>
import functools
import re

import jax
import jax.numpy as jnp
from jax.experimental import pallas as pl
from jax.experimental.pallas import tpu as pltpu

_LANE_WIDTHS = (1024, 512, 256, 128)   # candidate last-dim slab widths
_TINY_BYTES = 64 * 1024                # below this, plain jnp (XLA fuses)


def _round_up(x: int, m: int) -> int:
    return -(-x // m) * m


@functools.lru_cache(maxsize=None)
def _tpu_tuning():
    """(block_bytes, vmem_limit_bytes or None, tensorcores_per_chip)."""
    gen = 0
    try:
        kind = jax.devices()[0].device_kind
        m = re.search(r"(\d+)", kind)
        if m:
            gen = int(m.group(1))
    except Exception:  # non-TPU / unknown backend: fall through to safe defaults
        gen = 0
    if gen >= 7:
        # v7x: 3.2 TB/s HBM, 64 MiB VMEM, 2 TCs.  8 MiB blocks need an explicit
        # scoped-VMEM limit (4 double-buffered blocks = 32 MiB > 32 MiB default).
        return (8 << 20, 48 << 20, 2)
    if gen == 6:
        # v6e: 4 MiB blocks; 4 x 4 MiB = 16 MiB fits the 32 MiB default limit.
        return (4 << 20, None, 1)
    # v5e / older / unknown: 2 MiB blocks stay well under the 16 MiB default
    # scoped limit and already reach ~85% of the v5e HBM roofline.
    return (2 << 20, None, 1)


def _h_swish_kernel(x_ref, o_ref):
    # h_swish(x) = x * relu6(x + 3) / 6   (divide folded into a multiply).
    x = x_ref[...].astype(jnp.float32)
    hsig = jnp.clip(x + 3.0, 0.0, 6.0) * (1.0 / 6.0)
    o_ref[...] = (x * hsig).astype(o_ref.dtype)


def _h_swish_jnp(x: jax.Array) -> jax.Array:
    xf = x.astype(jnp.float32)
    return (xf * (jnp.clip(xf + 3.0, 0.0, 6.0) * (1.0 / 6.0))).astype(x.dtype)


def _choose_row_tile(rows: int, lane_w: int, itemsize: int,
                     block_bytes: int, cores: int) -> int:
    """Rows per block: ~block_bytes blocks, sublane-aligned, grid balanced
    (and split >=2 ways) only when the chip has 2 TensorCores."""
    sub_align = max(8, 32 // max(itemsize, 1))      # 8 f32 / 16 bf16 / 32 int8
    row_bytes = lane_w * itemsize
    max_tile = max(sub_align,
                   (block_bytes // row_bytes) // sub_align * sub_align)

    if rows <= max_tile:
        # Fits in one block.  Split ~in half only on 2-TC chips so both cores
        # get work; 1-TC chips keep a single full-array block (no extra step).
        if cores >= 2 and rows > 2 * sub_align:
            half = _round_up(-(-rows // 2), sub_align)
            if half < rows:
                return half
        return rows

    # Multi-block: keep blocks <= max_tile, make the step count even and the
    # blocks roughly equal-sized when the parallel axis is sharded over 2 TCs.
    n_blocks = -(-rows // max_tile)
    if cores >= 2 and n_blocks % 2 == 1:
        n_blocks += 1
    row_tile = min(max_tile, _round_up(-(-rows // n_blocks), sub_align))
    return max(row_tile, sub_align)


def _h_swish_pallas_2d(x2d: jax.Array, *, inplace: bool) -> jax.Array:
    rows, lane_w = x2d.shape
    dtype = x2d.dtype
    itemsize = jnp.dtype(dtype).itemsize
    block_bytes, vmem_limit, cores = _tpu_tuning()

    row_tile = _choose_row_tile(rows, lane_w, itemsize, block_bytes, cores)
    grid = (pl.cdiv(rows, row_tile),)   # Pallas masks the ragged last block.

    cp_kwargs = dict(dimension_semantics=("parallel",))
    if vmem_limit is not None:
        cp_kwargs["vmem_limit_bytes"] = vmem_limit

    call_kwargs = {}
    if inplace:
        # Only alias when the caller donates x at the jit boundary; otherwise
        # XLA inserts a defensive full-tensor copy that erases the benefit.
        call_kwargs["input_output_aliases"] = {0: 0}

    nbytes = rows * lane_w * itemsize
    return pl.pallas_call(
        _h_swish_kernel,
        out_shape=jax.ShapeDtypeStruct((rows, lane_w), dtype),
        grid_spec=pltpu.PrefetchScalarGridSpec(
            num_scalar_prefetch=0,
            grid=grid,
            in_specs=[pl.BlockSpec((row_tile, lane_w), lambda i: (i, 0))],
            out_specs=pl.BlockSpec((row_tile, lane_w), lambda i: (i, 0)),
        ),
        compiler_params=pltpu.CompilerParams(**cp_kwargs),
        cost_estimate=pl.CostEstimate(
            flops=4 * rows * lane_w,
            transcendentals=0,
            bytes_accessed=2 * nbytes,
        ),
        **call_kwargs,
    )(x2d)


def h_swish(x: jax.Array, *, inplace: bool = False) -> jax.Array:
    """Elementwise h_swish; accepts any shape (e.g. NCHW activations)."""
    orig_shape = x.shape
    n = x.size
    if n == 0:
        return x
    itemsize = jnp.dtype(x.dtype).itemsize

    # Tiny tensors: custom-call launch overhead would dominate; let XLA fuse.
    if n * itemsize < _TINY_BYTES:
        return _h_swish_jnp(x)

    flat = x.reshape(-1)

    # Widest lane-dense slab width that divides n (no split, no extra passes).
    lane_w = next((w for w in _LANE_WIDTHS if n % w == 0), None)
    if lane_w is not None:
        main, tail = flat, None
        n_main = n
    else:
        # Rare odd size: kernel on the 128-aligned prefix, <128-element tail
        # in plain jnp (negligible) — no full-tensor pad/slice passes.
        lane_w = 128
        n_main = (n // lane_w) * lane_w
        main, tail = flat[:n_main], flat[n_main:]

    rows = n_main // lane_w
    out2d = _h_swish_pallas_2d(main.reshape(rows, lane_w), inplace=inplace)
    out_flat = out2d.reshape(-1)
    if tail is not None:
        out_flat = jnp.concatenate([out_flat, _h_swish_jnp(tail)])
    return out_flat.reshape(orig_shape)


def h_swish_ref(x: jax.Array) -> jax.Array:
    """Pure-JAX reference matching PyTorch: x * relu6(x + 3) / 6."""
    xf = x.astype(jnp.float32)
    return (xf * (jnp.clip(xf + 3.0, 0.0, 6.0) / 6.0)).astype(x.dtype)


if __name__ == "__main__":
    key = jax.random.PRNGKey(0)
    k0, k1, k2, k3 = jax.random.split(key, 4)

    # 1) Small NCHW input consistent with MobileNetV3 usage — tiny-tensor
    #    bypass path (pure jnp, XLA fuses it).
    x_small = jax.random.normal(k0, (2, 4, 16, 16), dtype=jnp.float32) * 4.0
    out_small = jax.block_until_ready(h_swish(x_small))
    assert out_small.shape == x_small.shape and out_small.dtype == x_small.dtype
    assert jnp.allclose(out_small, h_swish_ref(x_small), atol=1e-6, rtol=1e-6)

    # 2) Medium activation — Pallas path, lane width 1024, single block
    #    (or a balanced 2-way split on v7x).
    x_med = jax.random.normal(k1, (2, 24, 56, 56), dtype=jnp.float32) * 4.0
    out_med = jax.block_until_ready(h_swish(x_med))
    assert jnp.allclose(out_med, h_swish_ref(x_med), atol=1e-6, rtol=1e-6)

    # 3) Larger activation — multi-block grid, ragged last block masked.
    x_big = jax.random.normal(k2, (4, 24, 112, 112), dtype=jnp.float32) * 4.0
    out_big = jax.block_until_ready(h_swish(x_big))
    assert jnp.allclose(out_big, h_swish_ref(x_big), atol=1e-6, rtol=1e-6)

    # 4) Element count not a multiple of 128 (and above the tiny threshold) —
    #    kernel on the 128-aligned prefix, 3-element tail in plain jnp.
    x_odd = jax.random.normal(k3, (1, 3, 131, 43), dtype=jnp.float32) * 4.0
    out_odd = jax.block_until_ready(h_swish(x_odd))
    assert out_odd.shape == x_odd.shape
    assert jnp.allclose(out_odd, h_swish_ref(x_odd), atol=1e-6, rtol=1e-6)

    # 5) bf16 stays bf16 through the kernel (half the HBM traffic).
    x_bf16 = (jax.random.normal(k1, (2, 24, 56, 56), dtype=jnp.float32) * 4.0
              ).astype(jnp.bfloat16)
    out_bf16 = jax.block_until_ready(h_swish(x_bf16))
    assert out_bf16.dtype == jnp.bfloat16
    assert jnp.allclose(out_bf16.astype(jnp.float32),
                        h_swish_ref(x_bf16).astype(jnp.float32),
                        atol=1e-2, rtol=1e-2)

    print("KERNEL_OK")
</pallas_src>

<mosaic_0001>
module attributes {stable_mosaic.version = 11 : i64} {
  func.func @_h_swish_kernel(%arg0: i32, %arg1: memref<147x1024xf32, #tpu.memory_space<vmem>>, %arg2: memref<147x1024xf32, #tpu.memory_space<vmem>>) attributes {dimension_semantics = [#tpu.dimension_semantics<parallel>], iteration_bounds = array<i64: 1>, scalar_prefetch = 0 : i64, scratch_operands = 0 : i64, tpu.core_type = #tpu.core_type<tc>, window_params = [{transform_indices = @transform_0, window_bounds = array<i64: 147, 1024>}, {transform_indices = @transform_1, window_bounds = array<i64: 147, 1024>}]} {
    %c0 = arith.constant 0 : index
    %c0_0 = arith.constant 0 : index
    %0 = vector.load %arg1[%c0, %c0_0] : memref<147x1024xf32, #tpu.memory_space<vmem>>, vector<147x1024xf32>
    %cst = arith.constant 3.000000e+00 : f32
    %1 = vector.broadcast %cst : f32 to vector<147x1024xf32>
    %2 = arith.addf %0, %1 : vector<147x1024xf32>
    %cst_1 = arith.constant 0.000000e+00 : f32
    %cst_2 = arith.constant 6.000000e+00 : f32
    %3 = vector.broadcast %cst_1 : f32 to vector<147x1024xf32>
    %4 = arith.maximumf %3, %2 : vector<147x1024xf32>
    %5 = vector.broadcast %cst_2 : f32 to vector<147x1024xf32>
    %6 = arith.minimumf %5, %4 : vector<147x1024xf32>
    %cst_3 = arith.constant 0.166666672 : f32
    %7 = vector.broadcast %cst_3 : f32 to vector<147x1024xf32>
    %8 = arith.mulf %6, %7 : vector<147x1024xf32>
    %9 = arith.mulf %0, %8 : vector<147x1024xf32>
    %c0_4 = arith.constant 0 : index
    %c0_5 = arith.constant 0 : index
    %10 = vector.load %arg2[%c0_4, %c0_5] : memref<147x1024xf32, #tpu.memory_space<vmem>>, vector<147x1024xf32>
    tpu.vector_store %arg2[%c0_4, %c0_5], %9 {strides = array<i32>} : memref<147x1024xf32, #tpu.memory_space<vmem>>, vector<147x1024xf32>,
    return
  }
  func.func @transform_0(%arg0: i32) -> (i32, i32) {
    %c0_i32 = arith.constant 0 : i32
    %c0_i32_0 = arith.constant 0 : i32
    return %arg0, %c0_i32 : i32, i32
  }
  func.func @transform_1(%arg0: i32) -> (i32, i32) {
    %c0_i32 = arith.constant 0 : i32
    %c0_i32_0 = arith.constant 0 : i32
    return %arg0, %c0_i32 : i32, i32
  }
}

</mosaic_0001>

<bundles_post_ra>
// kernel: tpu_custom_call.1
= control target key start
LH: loop header
LB: loop body
LE: loop exit
PB: predicated region body
PF: predicated region fallthrough
CT: control target
= control target key end

     0   :  { %6 = vsyncpa [#allocation3], 0  ;;  %s1522_s0 = inlined_call_operand.hbm [shape: f32[147,1024], index: 0, kind: input, shape index: {}]   ;;  %s1523_s1 = inlined_call_operand.hbm [shape: f32[147,1024], index: 1, kind: output, shape index: {}]  }
   0x1   :  { %7 = vsyncpa [#allocation4], 0  ;;  %s1152_s6 = smov [#allocation2]  }
   0x2   :  { %s13_s7 = sshll.u32 %s1152_s6, 4  ;;  %s14_s7 = int_to_ptr.vmem [resolvable:$true] %s13_s7 }
   0x3   :  { %s1116_s8 = scalar_lea.vmem %s14_s7, 19456  ;;  %p1121_p1 = scmp.lt.s32.totalorder %s14_s7, %s14_s7 }
   0x4   :  { %p1117_p0 = scmp.ne.s32.totalorder %s14_s7, %s1116_s8  ;;  %p1122_p2 = scmp.lt.s32.totalorder %s1116_s8, %s1116_s8 }
   0x6   :  { %p1123_p3 = por %p1122_p2, %p1121_p1 }
   0x8   :  { %p1124_p4 = pnand %p1123_p3, %p1117_p0 }
   0xa   :  { %1127 = shalt.err (!%p1124_p4)
}
   0xb   :  { %s1153_s9 = smov 1024   ;;  %s1154_s10 = smov 64  }
   0xc   :  { %19 = dma.hbm_to_vmem [thread:$0]  %s1522_s0, 19456, %s14_s7, [#allocation3], %s1153_s9, %s1153_s9, %s1154_s10  }
   0xd   :  { %1148 = dma.done.wait [#allocation3], 19456  }
   0xe   :  { %1149 = vsyncadd [#allocation3], 4294947840  ;;  %v23_v0 = vld [vmem:[#allocation2] sm:$0xff]  ;;  %v24_v1 = vld [vmem:[#allocation2 + $0x8] sm:$0xff]  ;;  %s1155_s0 = smov [#allocation5]  }
   0xf   :  { %v25_v2 = vld [vmem:[#allocation2 + $0x10] sm:$0xff]  ;;  %v175_v3 = vadd.f32 3.0, %v23_v0  ;;  %v176_v4 = vadd.f32 3.0, %v24_v1  ;;  %v26_v6 = vld [vmem:[#allocation2 + $0x18] sm:$0xff]  ;;  %v27_v7 = vld [vmem:[#allocation2 + $0x20] sm:$0xff]  ;;  %s1092_s13 = sshll.u32 %s1155_s0, 4  ;;  %s1093_s13 = int_to_ptr.vmem [resolvable:$true] %s1092_s13 }
  0x10   :  { %v177_v5 = vadd.f32 3.0, %v25_v2  ;;  %v28_v8 = vld [vmem:[#allocation2 + $0x28] sm:$0xff]  ;;  %v178_v9 = vadd.f32 3.0, %v26_v6  ;;  %v179_v10 = vadd.f32 3.0, %v27_v7  ;;  %v29_v12 = vld [vmem:[#allocation2 + $0x30] sm:$0xff]  ;;  %v30_v13 = vld [vmem:[#allocation2 + $0x38] sm:$0xff]  ;;  %p1133_p6 = scmp.lt.s32.totalorder %s1093_s13, %s1093_s13 }
  0x11   :  { %v180_v11 = vadd.f32 3.0, %v28_v8  ;;  %v327_v14 = vmax.f32 %v175_v3, 0.0  ;;  %v328_v15 = vmax.f32 %v176_v4, 0.0  ;;  %v181_v17 = vadd.f32 3.0, %v29_v12  ;;  %v1172_v30 = vld [vmem:[#allocation2 + $0x40] sm:$0xff]  ;;  %v1174_v31 = vld [vmem:[#allocation2 + $0x48] sm:$0xff] }
  0x12   :  { %v329_v16 = vmax.f32 %v177_v5, 0.0  ;;  %v330_v18 = vmax.f32 %v178_v9, 0.0  ;;  %v331_v19 = vmax.f32 %v179_v10, 0.0  ;;  %v182_v21 = vadd.f32 3.0, %v30_v13  ;;  %v1176_v32 = vld [vmem:[#allocation2 + $0x50] sm:$0xff]  ;;  %v34_v43 = vld [vmem:[#allocation2 + $0x58] sm:$0xff] }
  0x13   :  { %v332_v20 = vmax.f32 %v180_v11, 0.0  ;;  %v479_v22 = vmin.f32 %v327_v14, 6.0  ;;  %v480_v23 = vmin.f32 %v328_v15, 6.0  ;;  %v333_v25 = vmax.f32 %v181_v17, 0.0  ;;  %v35_v44 = vld [vmem:[#allocation2 + $0x60] sm:$0xff]  ;;  %v36_v45 = vld [vmem:[#allocation2 + $0x68] sm:$0xff] }
  0x14   :  { %v481_v24 = vmin.f32 %v329_v16, 6.0  ;;  %v482_v26 = vmin.f32 %v330_v18, 6.0  ;;  %v483_v27 = vmin.f32 %v331_v19, 6.0  ;;  %v334_v29 = vmax.f32 %v182_v21, 0.0  ;;  %v37_v58 = vld [vmem:[#allocation2 + $0x70] sm:$0xff]  ;;  %v1181_v63 = vld [vmem:[#allocation2 + $0x78] sm:$0xff] }
  0x15   :  { %v484_v28 = vmin.f32 %v332_v20, 6.0  ;;  %v631_v33 = vmul.f32 0.16666667, %v479_v22  ;;  %v632_v34 = vmul.f32 0.16666667, %v480_v23  ;;  %v485_v42 = vmin.f32 %v333_v25, 6.0 }
  0x16   :  { %v633_v35 = vmul.f32 0.16666667, %v481_v24  ;;  %v634_v36 = vmul.f32 0.16666667, %v482_v26  ;;  %v635_v37 = vmul.f32 0.16666667, %v483_v27 }
  0x17   :  { %v636_v38 = vmul.f32 0.16666667, %v484_v28  ;;  %v783_v39 = vmul.f32 %v631_v33, %v23_v0  ;;  %v784_v40 = vmul.f32 %v632_v34, %v24_v1  ;;  %v486_v49 = vmin.f32 %v334_v29, 6.0  ;;  %v1186_v14 = vld [vmem:[#allocation2 + $0x88] sm:$0xff]  ;;  %v1188_v15 = vld [vmem:[#allocation2 + $0x90] sm:$0xff]  ;;  %v42_v25 = vld [vmem:[#allocation2 + $0x98] sm:$0xff] }
  0x18   :  { %v785_v41 = vmul.f32 %v633_v35, %v25_v2  ;;  %v786_v46 = vmul.f32 %v634_v36, %v26_v6  ;;  %v787_v47 = vmul.f32 %v635_v37, %v27_v7  ;;  %v637_v50 = vmul.f32 0.16666667, %v485_v42  ;;  %v43_v26 = vld [vmem:[#allocation2 + $0xa0] sm:$0xff]  ;;  %v44_v27 = vld [vmem:[#allocation2 + $0xa8] sm:$0xff]  ;;  %s1128_s14 = scalar_lea.vmem %s1093_s13, 19456 }
  0x19   :  { %v788_v48 = vmul.f32 %v636_v38, %v28_v8  ;;  %935 = vst [vmem:[#allocation5] sm:$0xff] %v783_v39  ;;  %936 = vst [vmem:[#allocation5 + $0x8] sm:$0xff] %v784_v40  ;;  %v183_v51 = vadd.f32 3.0, %v1172_v30  ;;  %v184_v52 = vadd.f32 3.0, %v1174_v31  ;;  %v185_v53 = vadd.f32 3.0, %v1176_v32  ;;  %p1129_p5 = scmp.ne.s32.totalorder %s1093_s13, %s1128_s14  ;;  %p1134_p7 = scmp.lt.s32.totalorder %s1128_s14, %s1128_s14 }
  0x1a   :  { %937 = vst [vmem:[#allocation5 + $0x10] sm:$0xff] %v785_v41  ;;  %938 = vst [vmem:[#allocation5 + $0x18] sm:$0xff] %v786_v46  ;;  %v638_v54 = vmul.f32 0.16666667, %v486_v49  ;;  %v186_v55 = vadd.f32 3.0, %v34_v43  ;;  %v187_v56 = vadd.f32 3.0, %v35_v44  ;;  %v789_v59 = vmul.f32 %v637_v50, %v29_v12 }
  0x1b   :  { %939 = vst [vmem:[#allocation5 + $0x20] sm:$0xff] %v787_v47  ;;  %940 = vst [vmem:[#allocation5 + $0x28] sm:$0xff] %v788_v48  ;;  %v188_v57 = vadd.f32 3.0, %v36_v45  ;;  %v335_v60 = vmax.f32 %v183_v51, 0.0  ;;  %v336_v61 = vmax.f32 %v184_v52, 0.0  ;;  %v337_v62 = vmax.f32 %v185_v53, 0.0  ;;  %p1135_p8 = por %p1134_p7, %p1133_p6 }
  0x1c   :  { %v790_v0 = vmul.f32 %v638_v54, %v30_v13  ;;  %v338_v1 = vmax.f32 %v186_v55, 0.0  ;;  %v339_v2 = vmax.f32 %v187_v56, 0.0  ;;  %941 = vst [vmem:[#allocation5 + $0x30] sm:$0xff] %v789_v59  ;;  %v189_v7 = vadd.f32 3.0, %v37_v58  ;;  %v1184_v12 = vld [vmem:[#allocation2 + $0x80] sm:$0xff]  ;;  %v1196_v52 = vld [vmem:[#allocation2 + $0xb0] sm:$0xff] }
  0x1d   :  { %v340_v3 = vmax.f32 %v188_v57, 0.0  ;;  %v487_v4 = vmin.f32 %v335_v60, 6.0  ;;  %v488_v5 = vmin.f32 %v336_v61, 6.0  ;;  %v489_v6 = vmin.f32 %v337_v62, 6.0  ;;  %v1198_v53 = vld [vmem:[#allocation2 + $0xb8] sm:$0xff]  ;;  %v1201_v59 = vld [vmem:[#allocation2 + $0xc0] sm:$0xff]  ;;  %p1136_p9 = pnand %p1135_p8, %p1129_p5 }
  0x1e   :  { %942 = vst [vmem:[#allocation5 + $0x38] sm:$0xff] %v790_v0  ;;  %v490_v8 = vmin.f32 %v338_v1, 6.0  ;;  %v491_v9 = vmin.f32 %v339_v2, 6.0  ;;  %v190_v11 = vadd.f32 3.0, %v1181_v63  ;;  %v341_v24 = vmax.f32 %v189_v7, 0.0  ;;  %v1203_v60 = vld [vmem:[#allocation2 + $0xc8] sm:$0xff] }
  0x1f   :  { %v492_v10 = vmin.f32 %v340_v3, 6.0  ;;  %v639_v13 = vmul.f32 0.16666667, %v487_v4  ;;  %v640_v16 = vmul.f32 0.16666667, %v488_v5  ;;  %v191_v36 = vadd.f32 3.0, %v1184_v12 }
  0x20   :  { %v641_v17 = vmul.f32 0.16666667, %v489_v6  ;;  %v642_v18 = vmul.f32 0.16666667, %v490_v8  ;;  %v643_v19 = vmul.f32 0.16666667, %v491_v9 }
  0x21   :  { %v644_v20 = vmul.f32 0.16666667, %v492_v10  ;;  %v791_v21 = vmul.f32 %v639_v13, %v1172_v30  ;;  %v792_v22 = vmul.f32 %v640_v16, %v1174_v31  ;;  %v342_v34 = vmax.f32 %v190_v11, 0.0  ;;  %v1205_v61 = vld [vmem:[#allocation2 + $0xd0] sm:$0xff]  ;;  %v50_v7 = vld [vmem:[#allocation2 + $0xd8] sm:$0xff]  ;;  %v51_v8 = vld [vmem:[#allocation2 + $0xe0] sm:$0xff] }
  0x22   :  { %v793_v23 = vmul.f32 %v641_v17, %v1176_v32  ;;  %v794_v28 = vmul.f32 %v642_v18, %v34_v43  ;;  %v795_v29 = vmul.f32 %v643_v19, %v35_v44  ;;  %v493_v35 = vmin.f32 %v341_v24, 6.0  ;;  %v52_v9 = vld [vmem:[#allocation2 + $0xe8] sm:$0xff] }
  0x23   :  { %v796_v33 = vmul.f32 %v644_v20, %v36_v45  ;;  %943 = vst [vmem:[#allocation5 + $0x40] sm:$0xff] %v791_v21  ;;  %944 = vst [vmem:[#allocation5 + $0x48] sm:$0xff] %v792_v22  ;;  %v192_v30 = vadd.f32 3.0, %v1186_v14  ;;  %v193_v31 = vadd.f32 3.0, %v1188_v15  ;;  %v494_v32 = vmin.f32 %v342_v34, 6.0 }
  0x24   :  { %945 = vst [vmem:[#allocation5 + $0x50] sm:$0xff] %v793_v23  ;;  %946 = vst [vmem:[#allocation5 + $0x58] sm:$0xff] %v794_v28  ;;  %v194_v37 = vadd.f32 3.0, %v42_v25  ;;  %v195_v38 = vadd.f32 3.0, %v43_v26  ;;  %v196_v39 = vadd.f32 3.0, %v44_v27  ;;  %v343_v41 = vmax.f32 %v191_v36, 0.0 }
  0x25   :  { %947 = vst [vmem:[#allocation5 + $0x60] sm:$0xff] %v795_v29  ;;  %948 = vst [vmem:[#allocation5 + $0x68] sm:$0xff] %v796_v33  ;;  %v645_v40 = vmul.f32 0.16666667, %v493_v35  ;;  %v344_v42 = vmax.f32 %v192_v30, 0.0  ;;  %v345_v43 = vmax.f32 %v193_v31, 0.0 }
  0x26   :  { %v646_v44 = vmul.f32 0.16666667, %v494_v32  ;;  %v346_v45 = vmax.f32 %v194_v37, 0.0  ;;  %v347_v46 = vmax.f32 %v195_v38, 0.0  ;;  %v348_v47 = vmax.f32 %v196_v39, 0.0  ;;  %v1215_v33 = vld [vmem:[#allocation2 + $0xf0] sm:$0xff] }
  0x27   :  { %v797_v48 = vmul.f32 %v645_v40, %v37_v58  ;;  %v495_v49 = vmin.f32 %v343_v41, 6.0  ;;  %v496_v50 = vmin.f32 %v344_v42, 6.0  ;;  %v497_v51 = vmin.f32 %v345_v43, 6.0  ;;  %v1217_v31 = vld [vmem:[#allocation2 + $0xf8] sm:$0xff]  ;;  %v1219_v40 = vld [vmem:[#allocation2 + $0x100] sm:$0xff]  ;;  %v1221_v41 = vld [vmem:[#allocation2 + $0x108] sm:$0xff] }
  0x28   :  { %v798_v54 = vmul.f32 %v646_v44, %v1181_v63  ;;  %v498_v55 = vmin.f32 %v346_v45, 6.0  ;;  %v499_v56 = vmin.f32 %v347_v46, 6.0  ;;  %v500_v57 = vmin.f32 %v348_v47, 6.0  ;;  %v1223_v42 = vld [vmem:[#allocation2 + $0x110] sm:$0xff] }
  0x29   :  { %949 = vst [vmem:[#allocation5 + $0x70] sm:$0xff] %v797_v48  ;;  %v647_v58 = vmul.f32 0.16666667, %v495_v49  ;;  %v648_v62 = vmul.f32 0.16666667, %v496_v50  ;;  %v197_v6 = vadd.f32 3.0, %v1196_v52 }
  0x2a   :  { %v649_v0 = vmul.f32 0.16666667, %v497_v51  ;;  %950 = vst [vmem:[#allocation5 + $0x78] sm:$0xff] %v798_v54  ;;  %v650_v1 = vmul.f32 0.16666667, %v498_v55  ;;  %v198_v16 = vadd.f32 3.0, %v1198_v53 }
  0x2b   :  { %v651_v2 = vmul.f32 0.16666667, %v499_v56  ;;  %v652_v3 = vmul.f32 0.16666667, %v500_v57  ;;  %v799_v4 = vmul.f32 %v647_v58, %v1184_v12  ;;  %v800_v63 = vmul.f32 %v648_v62, %v1186_v14  ;;  %v58_v57 = vld [vmem:[#allocation2 + $0x118] sm:$0xff]  ;;  %v59_v58 = vld [vmem:[#allocation2 + $0x120] sm:$0xff] }
  0x2c   :  { %v801_v5 = vmul.f32 %v649_v0, %v1188_v15  ;;  %v802_v10 = vmul.f32 %v650_v1, %v42_v25  ;;  %v349_v17 = vmax.f32 %v197_v6, 0.0  ;;  %v199_v12 = vadd.f32 3.0, %v1201_v59 }
  0x2d   :  { %v803_v11 = vmul.f32 %v651_v2, %v43_v26  ;;  %v804_v13 = vmul.f32 %v652_v3, %v44_v27  ;;  %951 = vst [vmem:[#allocation5 + $0x80] sm:$0xff] %v799_v4  ;;  %952 = vst [vmem:[#allocation5 + $0x88] sm:$0xff] %v800_v63  ;;  %v200_v14 = vadd.f32 3.0, %v1203_v60  ;;  %v201_v15 = vadd.f32 3.0, %v1205_v61 }
  0x2e   :  { %953 = vst [vmem:[#allocation5 + $0x90] sm:$0xff] %v801_v5  ;;  %954 = vst [vmem:[#allocation5 + $0x98] sm:$0xff] %v802_v10  ;;  %v350_v18 = vmax.f32 %v198_v16, 0.0  ;;  %v202_v19 = vadd.f32 3.0, %v50_v7  ;;  %v203_v20 = vadd.f32 3.0, %v51_v8  ;;  %v204_v21 = vadd.f32 3.0, %v52_v9 }
  0x2f   :  { %955 = vst [vmem:[#allocation5 + $0xa0] sm:$0xff] %v803_v11  ;;  %956 = vst [vmem:[#allocation5 + $0xa8] sm:$0xff] %v804_v13  ;;  %v501_v22 = vmin.f32 %v349_v17, 6.0  ;;  %v351_v23 = vmax.f32 %v199_v12, 0.0  ;;  %v352_v24 = vmax.f32 %v200_v14, 0.0  ;;  %v353_v25 = vmax.f32 %v201_v15, 0.0 }
  0x30   :  { %v502_v26 = vmin.f32 %v350_v18, 6.0  ;;  %v354_v27 = vmax.f32 %v202_v19, 0.0  ;;  %v355_v28 = vmax.f32 %v203_v20, 0.0  ;;  %v356_v29 = vmax.f32 %v204_v21, 0.0  ;;  %v1235_v17 = vld [vmem:[#allocation2 + $0x130] sm:$0xff]  ;;  %v1237_v19 = vld [vmem:[#allocation2 + $0x138] sm:$0xff] }
  0x31   :  { %v653_v34 = vmul.f32 0.16666667, %v501_v22  ;;  %v503_v35 = vmin.f32 %v351_v23, 6.0  ;;  %v504_v36 = vmin.f32 %v352_v24, 6.0  ;;  %v505_v30 = vmin.f32 %v353_v25, 6.0  ;;  %v1239_v24 = vld [vmem:[#allocation2 + $0x140] sm:$0xff] }
  0x32   :  { %v654_v32 = vmul.f32 0.16666667, %v502_v26  ;;  %v506_v37 = vmin.f32 %v354_v27, 6.0  ;;  %v507_v38 = vmin.f32 %v355_v28, 6.0  ;;  %v508_v39 = vmin.f32 %v356_v29, 6.0  ;;  %v1241_v25 = vld [vmem:[#allocation2 + $0x148] sm:$0xff] }
  0x33   :  { %v805_v43 = vmul.f32 %v653_v34, %v1196_v52  ;;  %v655_v44 = vmul.f32 0.16666667, %v503_v35  ;;  %v656_v45 = vmul.f32 0.16666667, %v504_v36  ;;  %v657_v46 = vmul.f32 0.16666667, %v505_v30 }
  0x34   :  { %v806_v47 = vmul.f32 %v654_v32, %v1198_v53  ;;  %v658_v48 = vmul.f32 0.16666667, %v506_v37  ;;  %v659_v49 = vmul.f32 0.16666667, %v507_v38  ;;  %v660_v50 = vmul.f32 0.16666667, %v508_v39 }
  0x35   :  { %957 = vst [vmem:[#allocation5 + $0xb0] sm:$0xff] %v805_v43  ;;  %v807_v51 = vmul.f32 %v655_v44, %v1201_v59  ;;  %v808_v54 = vmul.f32 %v656_v45, %v1203_v60  ;;  %v809_v55 = vmul.f32 %v657_v46, %v1205_v61  ;;  %v205_v56 = vadd.f32 3.0, %v1215_v33  ;;  %v60_v52 = vld [vmem:[#allocation2 + $0x128] sm:$0xff]  ;;  %v1243_v26 = vld [vmem:[#allocation2 + $0x150] sm:$0xff]  ;;  %v66_v44 = vld [vmem:[#allocation2 + $0x158] sm:$0xff] }
  0x36   :  { %958 = vst [vmem:[#allocation5 + $0xb8] sm:$0xff] %v806_v47  ;;  %v810_v62 = vmul.f32 %v658_v48, %v50_v7  ;;  %v811_v0 = vmul.f32 %v659_v49, %v51_v8  ;;  %v812_v1 = vmul.f32 %v660_v50, %v52_v9  ;;  %v206_v53 = vadd.f32 3.0, %v1217_v31  ;;  %v67_v45 = vld [vmem:[#allocation2 + $0x160] sm:$0xff] }
  0x37   :  { %959 = vst [vmem:[#allocation5 + $0xc0] sm:$0xff] %v807_v51  ;;  %960 = vst [vmem:[#allocation5 + $0xc8] sm:$0xff] %v808_v54  ;;  %v357_v2 = vmax.f32 %v205_v56, 0.0  ;;  %v207_v59 = vadd.f32 3.0, %v1219_v40  ;;  %v208_v60 = vadd.f32 3.0, %v1221_v41  ;;  %v209_v61 = vadd.f32 3.0, %v1223_v42 }
  0x38   :  { %961 = vst [vmem:[#allocation5 + $0xd0] sm:$0xff] %v809_v55  ;;  %962 = vst [vmem:[#allocation5 + $0xd8] sm:$0xff] %v810_v62  ;;  %v358_v3 = vmax.f32 %v206_v53, 0.0  ;;  %v210_v4 = vadd.f32 3.0, %v58_v57  ;;  %v211_v63 = vadd.f32 3.0, %v59_v58  ;;  %v212_v5 = vadd.f32 3.0, %v60_v52 }
  0x39   :  { %963 = vst [vmem:[#allocation5 + $0xe0] sm:$0xff] %v811_v0  ;;  %964 = vst [vmem:[#allocation5 + $0xe8] sm:$0xff] %v812_v1  ;;  %v509_v6 = vmin.f32 %v357_v2, 6.0  ;;  %v359_v7 = vmax.f32 %v207_v59, 0.0  ;;  %v360_v8 = vmax.f32 %v208_v60, 0.0  ;;  %v361_v9 = vmax.f32 %v209_v61, 0.0 }
  0x3a   :  { %v510_v10 = vmin.f32 %v358_v3, 6.0  ;;  %v362_v11 = vmax.f32 %v210_v4, 0.0  ;;  %v363_v13 = vmax.f32 %v211_v63, 0.0  ;;  %v364_v16 = vmax.f32 %v212_v5, 0.0  ;;  %v1255_v2 = vld [vmem:[#allocation2 + $0x170] sm:$0xff]  ;;  %v1257_v4 = vld [vmem:[#allocation2 + $0x178] sm:$0xff] }
  0x3b   :  { %v661_v12 = vmul.f32 0.16666667, %v509_v6  ;;  %v511_v14 = vmin.f32 %v359_v7, 6.0  ;;  %v512_v15 = vmin.f32 %v360_v8, 6.0  ;;  %v513_v18 = vmin.f32 %v361_v9, 6.0  ;;  %v1259_v8 = vld [vmem:[#allocation2 + $0x180] sm:$0xff] }
  0x3c   :  { %v662_v20 = vmul.f32 0.16666667, %v510_v10  ;;  %v514_v21 = vmin.f32 %v362_v11, 6.0  ;;  %v515_v22 = vmin.f32 %v363_v13, 6.0  ;;  %v516_v23 = vmin.f32 %v364_v16, 6.0  ;;  %v1261_v9 = vld [vmem:[#allocation2 + $0x188] sm:$0xff] }
  0x3d   :  { %v813_v27 = vmul.f32 %v661_v12, %v1215_v33  ;;  %v663_v28 = vmul.f32 0.16666667, %v511_v14  ;;  %v664_v29 = vmul.f32 0.16666667, %v512_v15  ;;  %v665_v34 = vmul.f32 0.16666667, %v513_v18 }
  0x3e   :  { %v814_v35 = vmul.f32 %v662_v20, %v1217_v31  ;;  %v666_v36 = vmul.f32 0.16666667, %v514_v21  ;;  %v667_v30 = vmul.f32 0.16666667, %v515_v22  ;;  %v668_v32 = vmul.f32 0.16666667, %v516_v23 }
  0x3f   :  { %965 = vst [vmem:[#allocation5 + $0xf0] sm:$0xff] %v813_v27  ;;  %v815_v37 = vmul.f32 %v663_v28, %v1219_v40  ;;  %v816_v38 = vmul.f32 %v664_v29, %v1221_v41  ;;  %v817_v39 = vmul.f32 %v665_v34, %v1223_v42  ;;  %v213_v43 = vadd.f32 3.0, %v1235_v17  ;;  %v68_v33 = vld [vmem:[#allocation2 + $0x168] sm:$0xff]  ;;  %v1263_v10 = vld [vmem:[#allocation2 + $0x190] sm:$0xff]  ;;  %v74_v28 = vld [vmem:[#allocation2 + $0x198] sm:$0xff] }
  0x40   :  { %966 = vst [vmem:[#allocation5 + $0xf8] sm:$0xff] %v814_v35  ;;  %v818_v46 = vmul.f32 %v666_v36, %v58_v57  ;;  %v819_v47 = vmul.f32 %v667_v30, %v59_v58  ;;  %v820_v48 = vmul.f32 %v668_v32, %v60_v52  ;;  %v214_v31 = vadd.f32 3.0, %v1237_v19  ;;  %v75_v29 = vld [vmem:[#allocation2 + $0x1a0] sm:$0xff] }
  0x41   :  { %967 = vst [vmem:[#allocation5 + $0x100] sm:$0xff] %v815_v37  ;;  %968 = vst [vmem:[#allocation5 + $0x108] sm:$0xff] %v816_v38  ;;  %v365_v49 = vmax.f32 %v213_v43, 0.0  ;;  %v215_v40 = vadd.f32 3.0, %v1239_v24  ;;  %v216_v41 = vadd.f32 3.0, %v1241_v25  ;;  %v217_v42 = vadd.f32 3.0, %v1243_v26 }
  0x42   :  { %969 = vst [vmem:[#allocation5 + $0x110] sm:$0xff] %v817_v39  ;;  %970 = vst [vmem:[#allocation5 + $0x118] sm:$0xff] %v818_v46  ;;  %v366_v50 = vmax.f32 %v214_v31, 0.0  ;;  %v218_v51 = vadd.f32 3.0, %v66_v44  ;;  %v219_v54 = vadd.f32 3.0, %v67_v45  ;;  %v220_v55 = vadd.f32 3.0, %v68_v33 }
  0x43   :  { %971 = vst [vmem:[#allocation5 + $0x120] sm:$0xff] %v819_v47  ;;  %972 = vst [vmem:[#allocation5 + $0x128] sm:$0xff] %v820_v48  ;;  %v517_v56 = vmin.f32 %v365_v49, 6.0  ;;  %v367_v57 = vmax.f32 %v215_v40, 0.0  ;;  %v368_v58 = vmax.f32 %v216_v41, 0.0  ;;  %v369_v52 = vmax.f32 %v217_v42, 0.0 }
  0x44   :  { %v518_v62 = vmin.f32 %v366_v50, 6.0  ;;  %v370_v0 = vmax.f32 %v218_v51, 0.0  ;;  %v371_v1 = vmax.f32 %v219_v54, 0.0  ;;  %v372_v53 = vmax.f32 %v220_v55, 0.0  ;;  %v1275_v49 = vld [vmem:[#allocation2 + $0x1b0] sm:$0xff]  ;;  %v1277_v51 = vld [vmem:[#allocation2 + $0x1b8] sm:$0xff] }
  0x45   :  { %v669_v59 = vmul.f32 0.16666667, %v517_v56  ;;  %v519_v60 = vmin.f32 %v367_v57, 6.0  ;;  %v520_v61 = vmin.f32 %v368_v58, 6.0  ;;  %v521_v3 = vmin.f32 %v369_v52, 6.0  ;;  %v1279_v58 = vld [vmem:[#allocation2 + $0x1c0] sm:$0xff] }
  0x46   :  { %v670_v63 = vmul.f32 0.16666667, %v518_v62  ;;  %v522_v5 = vmin.f32 %v370_v0, 6.0  ;;  %v523_v6 = vmin.f32 %v371_v1, 6.0  ;;  %v524_v7 = vmin.f32 %v372_v53, 6.0  ;;  %v1281_v52 = vld [vmem:[#allocation2 + $0x1c8] sm:$0xff] }
  0x47   :  { %v821_v11 = vmul.f32 %v669_v59, %v1235_v17  ;;  %v671_v13 = vmul.f32 0.16666667, %v519_v60  ;;  %v672_v16 = vmul.f32 0.16666667, %v520_v61  ;;  %v673_v12 = vmul.f32 0.16666667, %v521_v3 }
  0x48   :  { %v822_v14 = vmul.f32 %v670_v63, %v1237_v19  ;;  %v674_v15 = vmul.f32 0.16666667, %v522_v5  ;;  %v675_v18 = vmul.f32 0.16666667, %v523_v6  ;;  %v676_v20 = vmul.f32 0.16666667, %v524_v7 }
  0x49   :  { %973 = vst [vmem:[#allocation5 + $0x130] sm:$0xff] %v821_v11  ;;  %v823_v21 = vmul.f32 %v671_v13, %v1239_v24  ;;  %v824_v22 = vmul.f32 %v672_v16, %v1241_v25  ;;  %v825_v23 = vmul.f32 %v673_v12, %v1243_v26  ;;  %v221_v27 = vadd.f32 3.0, %v1255_v2  ;;  %v76_v17 = vld [vmem:[#allocation2 + $0x1a8] sm:$0xff]  ;;  %v1283_v62 = vld [vmem:[#allocation2 + $0x1d0] sm:$0xff]  ;;  %v82_v13 = vld [vmem:[#allocation2 + $0x1d8] sm:$0xff] }
  0x4a   :  { %974 = vst [vmem:[#allocation5 + $0x138] sm:$0xff] %v822_v14  ;;  %v826_v34 = vmul.f32 %v674_v15, %v66_v44  ;;  %v827_v35 = vmul.f32 %v675_v18, %v67_v45  ;;  %v828_v36 = vmul.f32 %v676_v20, %v68_v33  ;;  %v222_v19 = vadd.f32 3.0, %v1257_v4  ;;  %v83_v16 = vld [vmem:[#allocation2 + $0x1e0] sm:$0xff] }
  0x4b   :  { %975 = vst [vmem:[#allocation5 + $0x140] sm:$0xff] %v823_v21  ;;  %976 = vst [vmem:[#allocation5 + $0x148] sm:$0xff] %v824_v22  ;;  %v373_v30 = vmax.f32 %v221_v27, 0.0  ;;  %v223_v24 = vadd.f32 3.0, %v1259_v8  ;;  %v224_v25 = vadd.f32 3.0, %v1261_v9  ;;  %v225_v26 = vadd.f32 3.0, %v1263_v10 }
  0x4c   :  { %977 = vst [vmem:[#allocation5 + $0x150] sm:$0xff] %v825_v23  ;;  %978 = vst [vmem:[#allocation5 + $0x158] sm:$0xff] %v826_v34  ;;  %v374_v32 = vmax.f32 %v222_v19, 0.0  ;;  %v226_v37 = vadd.f32 3.0, %v74_v28  ;;  %v227_v38 = vadd.f32 3.0, %v75_v29  ;;  %v228_v39 = vadd.f32 3.0, %v76_v17 }
  0x4d   :  { %979 = vst [vmem:[#allocation5 + $0x160] sm:$0xff] %v827_v35  ;;  %980 = vst [vmem:[#allocation5 + $0x168] sm:$0xff] %v828_v36  ;;  %v525_v43 = vmin.f32 %v373_v30, 6.0  ;;  %v375_v44 = vmax.f32 %v223_v24, 0.0  ;;  %v376_v45 = vmax.f32 %v224_v25, 0.0  ;;  %v377_v33 = vmax.f32 %v225_v26, 0.0 }
  0x4e   :  { %v526_v46 = vmin.f32 %v374_v32, 6.0  ;;  %v378_v47 = vmax.f32 %v226_v37, 0.0  ;;  %v379_v48 = vmax.f32 %v227_v38, 0.0  ;;  %v380_v31 = vmax.f32 %v228_v39, 0.0  ;;  %v1295_v30 = vld [vmem:[#allocation2 + $0x1f0] sm:$0xff]  ;;  %v1297_v37 = vld [vmem:[#allocation2 + $0x1f8] sm:$0xff] }
  0x4f   :  { %v677_v40 = vmul.f32 0.16666667, %v525_v43  ;;  %v527_v41 = vmin.f32 %v375_v44, 6.0  ;;  %v528_v42 = vmin.f32 %v376_v45, 6.0  ;;  %v529_v50 = vmin.f32 %v377_v33, 6.0  ;;  %v1299_v45 = vld [vmem:[#allocation2 + $0x200] sm:$0xff] }
  0x50   :  { %v678_v54 = vmul.f32 0.16666667, %v526_v46  ;;  %v530_v55 = vmin.f32 %v378_v47, 6.0  ;;  %v531_v56 = vmin.f32 %v379_v48, 6.0  ;;  %v532_v57 = vmin.f32 %v380_v31, 6.0  ;;  %v1301_v33 = vld [vmem:[#allocation2 + $0x208] sm:$0xff] }
  0x51   :  { %v829_v0 = vmul.f32 %v677_v40, %v1255_v2  ;;  %v679_v1 = vmul.f32 0.16666667, %v527_v41  ;;  %v680_v53 = vmul.f32 0.16666667, %v528_v42  ;;  %v681_v59 = vmul.f32 0.16666667, %v529_v50 }
  0x52   :  { %v830_v60 = vmul.f32 %v678_v54, %v1257_v4  ;;  %v682_v61 = vmul.f32 0.16666667, %v530_v55  ;;  %v683_v3 = vmul.f32 0.16666667, %v531_v56  ;;  %v684_v63 = vmul.f32 0.16666667, %v532_v57 }
  0x53   :  { %981 = vst [vmem:[#allocation5 + $0x170] sm:$0xff] %v829_v0  ;;  %v831_v5 = vmul.f32 %v679_v1, %v1259_v8  ;;  %v832_v6 = vmul.f32 %v680_v53, %v1261_v9  ;;  %v833_v7 = vmul.f32 %v681_v59, %v1263_v10  ;;  %v229_v11 = vadd.f32 3.0, %v1275_v49  ;;  %v84_v2 = vld [vmem:[#allocation2 + $0x1e8] sm:$0xff]  ;;  %v1303_v46 = vld [vmem:[#allocation2 + $0x210] sm:$0xff]  ;;  %v90_v1 = vld [vmem:[#allocation2 + $0x218] sm:$0xff] }
  0x54   :  { %982 = vst [vmem:[#allocation5 + $0x178] sm:$0xff] %v830_v60  ;;  %v834_v12 = vmul.f32 %v682_v61, %v74_v28  ;;  %v835_v14 = vmul.f32 %v683_v3, %v75_v29  ;;  %v836_v15 = vmul.f32 %v684_v63, %v76_v17  ;;  %v230_v4 = vadd.f32 3.0, %v1277_v51  ;;  %v91_v53 = vld [vmem:[#allocation2 + $0x220] sm:$0xff] }
  0x55   :  { %983 = vst [vmem:[#allocation5 + $0x180] sm:$0xff] %v831_v5  ;;  %984 = vst [vmem:[#allocation5 + $0x188] sm:$0xff] %v832_v6  ;;  %v381_v18 = vmax.f32 %v229_v11, 0.0  ;;  %v231_v8 = vadd.f32 3.0, %v1279_v58  ;;  %v232_v9 = vadd.f32 3.0, %v1281_v52  ;;  %v233_v10 = vadd.f32 3.0, %v1283_v62 }
  0x56   :  { %985 = vst [vmem:[#allocation5 + $0x190] sm:$0xff] %v833_v7  ;;  %986 = vst [vmem:[#allocation5 + $0x198] sm:$0xff] %v834_v12  ;;  %v382_v20 = vmax.f32 %v230_v4, 0.0  ;;  %v234_v21 = vadd.f32 3.0, %v82_v13  ;;  %v235_v22 = vadd.f32 3.0, %v83_v16  ;;  %v236_v23 = vadd.f32 3.0, %v84_v2 }
  0x57   :  { %987 = vst [vmem:[#allocation5 + $0x1a0] sm:$0xff] %v835_v14  ;;  %988 = vst [vmem:[#allocation5 + $0x1a8] sm:$0xff] %v836_v15  ;;  %v533_v27 = vmin.f32 %v381_v18, 6.0  ;;  %v383_v28 = vmax.f32 %v231_v8, 0.0  ;;  %v384_v29 = vmax.f32 %v232_v9, 0.0  ;;  %v385_v17 = vmax.f32 %v233_v10, 0.0 }
  0x58   :  { %v534_v34 = vmin.f32 %v382_v20, 6.0  ;;  %v386_v35 = vmax.f32 %v234_v21, 0.0  ;;  %v387_v36 = vmax.f32 %v235_v22, 0.0  ;;  %v388_v19 = vmax.f32 %v236_v23, 0.0  ;;  %v1315_v18 = vld [vmem:[#allocation2 + $0x230] sm:$0xff]  ;;  %v1317_v21 = vld [vmem:[#allocation2 + $0x238] sm:$0xff] }
  0x59   :  { %v685_v24 = vmul.f32 0.16666667, %v533_v27  ;;  %v535_v25 = vmin.f32 %v383_v28, 6.0  ;;  %v536_v26 = vmin.f32 %v384_v29, 6.0  ;;  %v537_v32 = vmin.f32 %v385_v17, 6.0  ;;  %v1319_v29 = vld [vmem:[#allocation2 + $0x240] sm:$0xff] }
  0x5a   :  { %v686_v38 = vmul.f32 0.16666667, %v534_v34  ;;  %v538_v39 = vmin.f32 %v386_v35, 6.0  ;;  %v539_v43 = vmin.f32 %v387_v36, 6.0  ;;  %v540_v44 = vmin.f32 %v388_v19, 6.0  ;;  %v1321_v17 = vld [vmem:[#allocation2 + $0x248] sm:$0xff] }
  0x5b   :  { %v837_v47 = vmul.f32 %v685_v24, %v1275_v49  ;;  %v687_v48 = vmul.f32 0.16666667, %v535_v25  ;;  %v688_v31 = vmul.f32 0.16666667, %v536_v26  ;;  %v689_v40 = vmul.f32 0.16666667, %v537_v32 }
  0x5c   :  { %v838_v41 = vmul.f32 %v686_v38, %v1277_v51  ;;  %v690_v42 = vmul.f32 0.16666667, %v538_v39  ;;  %v691_v50 = vmul.f32 0.16666667, %v539_v43  ;;  %v692_v54 = vmul.f32 0.16666667, %v540_v44 }
  0x5d   :  { %989 = vst [vmem:[#allocation5 + $0x1b0] sm:$0xff] %v837_v47  ;;  %v839_v55 = vmul.f32 %v687_v48, %v1279_v58  ;;  %v840_v56 = vmul.f32 %v688_v31, %v1281_v52  ;;  %v841_v57 = vmul.f32 %v689_v40, %v1283_v62  ;;  %v237_v0 = vadd.f32 3.0, %v1295_v30  ;;  %v92_v49 = vld [vmem:[#allocation2 + $0x228] sm:$0xff]  ;;  %v1323_v34 = vld [vmem:[#allocation2 + $0x250] sm:$0xff]  ;;  %v98_v48 = vld [vmem:[#allocation2 + $0x258] sm:$0xff] }
  0x5e   :  { %990 = vst [vmem:[#allocation5 + $0x1b8] sm:$0xff] %v838_v41  ;;  %v842_v59 = vmul.f32 %v690_v42, %v82_v13  ;;  %v843_v60 = vmul.f32 %v691_v50, %v83_v16  ;;  %v844_v61 = vmul.f32 %v692_v54, %v84_v2  ;;  %v238_v51 = vadd.f32 3.0, %v1297_v37  ;;  %v99_v31 = vld [vmem:[#allocation2 + $0x260] sm:$0xff] }
  0x5f   :  { %991 = vst [vmem:[#allocation5 + $0x1c0] sm:$0xff] %v839_v55  ;;  %992 = vst [vmem:[#allocation5 + $0x1c8] sm:$0xff] %v840_v56  ;;  %v389_v3 = vmax.f32 %v237_v0, 0.0  ;;  %v239_v58 = vadd.f32 3.0, %v1299_v45  ;;  %v240_v52 = vadd.f32 3.0, %v1301_v33  ;;  %v241_v62 = vadd.f32 3.0, %v1303_v46 }
  0x60   :  { %993 = vst [vmem:[#allocation5 + $0x1d0] sm:$0xff] %v841_v57  ;;  %994 = vst [vmem:[#allocation5 + $0x1d8] sm:$0xff] %v842_v59  ;;  %v390_v63 = vmax.f32 %v238_v51, 0.0  ;;  %v242_v5 = vadd.f32 3.0, %v90_v1  ;;  %v243_v6 = vadd.f32 3.0, %v91_v53  ;;  %v244_v7 = vadd.f32 3.0, %v92_v49 }
  0x61   :  { %995 = vst [vmem:[#allocation5 + $0x1e0] sm:$0xff] %v843_v60  ;;  %996 = vst [vmem:[#allocation5 + $0x1e8] sm:$0xff] %v844_v61  ;;  %v541_v11 = vmin.f32 %v389_v3, 6.0  ;;  %v391_v13 = vmax.f32 %v239_v58, 0.0  ;;  %v392_v16 = vmax.f32 %v240_v52, 0.0  ;;  %v393_v2 = vmax.f32 %v241_v62, 0.0 }
  0x62   :  { %v542_v12 = vmin.f32 %v390_v63, 6.0  ;;  %v394_v14 = vmax.f32 %v242_v5, 0.0  ;;  %v395_v15 = vmax.f32 %v243_v6, 0.0  ;;  %v396_v4 = vmax.f32 %v244_v7, 0.0  ;;  %v1335_v3 = vld [vmem:[#allocation2 + $0x270] sm:$0xff]  ;;  %v1337_v5 = vld [vmem:[#allocation2 + $0x278] sm:$0xff] }
  0x63   :  { %v693_v8 = vmul.f32 0.16666667, %v541_v11  ;;  %v543_v9 = vmin.f32 %v391_v13, 6.0  ;;  %v544_v10 = vmin.f32 %v392_v16, 6.0  ;;  %v545_v20 = vmin.f32 %v393_v2, 6.0  ;;  %v1339_v16 = vld [vmem:[#allocation2 + $0x280] sm:$0xff] }
  0x64   :  { %v694_v22 = vmul.f32 0.16666667, %v542_v12  ;;  %v546_v23 = vmin.f32 %v394_v14, 6.0  ;;  %v547_v27 = vmin.f32 %v395_v15, 6.0  ;;  %v548_v28 = vmin.f32 %v396_v4, 6.0  ;;  %v1341_v2 = vld [vmem:[#allocation2 + $0x288] sm:$0xff] }
  0x65   :  { %v845_v35 = vmul.f32 %v693_v8, %v1295_v30  ;;  %v695_v36 = vmul.f32 0.16666667, %v543_v9  ;;  %v696_v19 = vmul.f32 0.16666667, %v544_v10  ;;  %v697_v24 = vmul.f32 0.16666667, %v545_v20 }
  0x66   :  { %v846_v25 = vmul.f32 %v694_v22, %v1297_v37  ;;  %v698_v26 = vmul.f32 0.16666667, %v546_v23  ;;  %v699_v32 = vmul.f32 0.16666667, %v547_v27  ;;  %v700_v38 = vmul.f32 0.16666667, %v548_v28 }
  0x67   :  { %997 = vst [vmem:[#allocation5 + $0x1f0] sm:$0xff] %v845_v35  ;;  %v847_v39 = vmul.f32 %v695_v36, %v1299_v45  ;;  %v848_v43 = vmul.f32 %v696_v19, %v1301_v33  ;;  %v849_v44 = vmul.f32 %v697_v24, %v1303_v46  ;;  %v245_v47 = vadd.f32 3.0, %v1315_v18  ;;  %v100_v30 = vld [vmem:[#allocation2 + $0x268] sm:$0xff]  ;;  %v1343_v12 = vld [vmem:[#allocation2 + $0x290] sm:$0xff]  ;;  %v106_v36 = vld [vmem:[#allocation2 + $0x298] sm:$0xff] }
  0x68   :  { %998 = vst [vmem:[#allocation5 + $0x1f8] sm:$0xff] %v846_v25  ;;  %v850_v40 = vmul.f32 %v698_v26, %v90_v1  ;;  %v851_v41 = vmul.f32 %v699_v32, %v91_v53  ;;  %v852_v42 = vmul.f32 %v700_v38, %v92_v49  ;;  %v246_v37 = vadd.f32 3.0, %v1317_v21  ;;  %v107_v19 = vld [vmem:[#allocation2 + $0x2a0] sm:$0xff] }
  0x69   :  { %999 = vst [vmem:[#allocation5 + $0x200] sm:$0xff] %v847_v39  ;;  %1000 = vst [vmem:[#allocation5 + $0x208] sm:$0xff] %v848_v43  ;;  %v397_v50 = vmax.f32 %v245_v47, 0.0  ;;  %v247_v45 = vadd.f32 3.0, %v1319_v29  ;;  %v248_v33 = vadd.f32 3.0, %v1321_v17  ;;  %v249_v46 = vadd.f32 3.0, %v1323_v34 }
  0x6a   :  { %1001 = vst [vmem:[#allocation5 + $0x210] sm:$0xff] %v849_v44  ;;  %1002 = vst [vmem:[#allocation5 + $0x218] sm:$0xff] %v850_v40  ;;  %v398_v54 = vmax.f32 %v246_v37, 0.0  ;;  %v250_v55 = vadd.f32 3.0, %v98_v48  ;;  %v251_v56 = vadd.f32 3.0, %v99_v31  ;;  %v252_v57 = vadd.f32 3.0, %v100_v30 }
  0x6b   :  { %1003 = vst [vmem:[#allocation5 + $0x220] sm:$0xff] %v851_v41  ;;  %1004 = vst [vmem:[#allocation5 + $0x228] sm:$0xff] %v852_v42  ;;  %v549_v0 = vmin.f32 %v397_v50, 6.0  ;;  %v399_v1 = vmax.f32 %v247_v45, 0.0  ;;  %v400_v53 = vmax.f32 %v248_v33, 0.0  ;;  %v401_v49 = vmax.f32 %v249_v46, 0.0 }
  0x6c   :  { %v550_v59 = vmin.f32 %v398_v54, 6.0  ;;  %v402_v60 = vmax.f32 %v250_v55, 0.0  ;;  %v403_v61 = vmax.f32 %v251_v56, 0.0  ;;  %v404_v51 = vmax.f32 %v252_v57, 0.0  ;;  %v1355_v50 = vld [vmem:[#allocation2 + $0x2b0] sm:$0xff]  ;;  %v1357_v55 = vld [vmem:[#allocation2 + $0x2b8] sm:$0xff] }
  0x6d   :  { %v701_v58 = vmul.f32 0.16666667, %v549_v0  ;;  %v551_v52 = vmin.f32 %v399_v1, 6.0  ;;  %v552_v62 = vmin.f32 %v400_v53, 6.0  ;;  %v553_v63 = vmin.f32 %v401_v49, 6.0  ;;  %v1359_v53 = vld [vmem:[#allocation2 + $0x2c0] sm:$0xff] }
  0x6e   :  { %v702_v6 = vmul.f32 0.16666667, %v550_v59  ;;  %v554_v7 = vmin.f32 %v402_v60, 6.0  ;;  %v555_v11 = vmin.f32 %v403_v61, 6.0  ;;  %v556_v13 = vmin.f32 %v404_v51, 6.0  ;;  %v1361_v49 = vld [vmem:[#allocation2 + $0x2c8] sm:$0xff] }
  0x6f   :  { %v853_v14 = vmul.f32 %v701_v58, %v1315_v18  ;;  %v703_v15 = vmul.f32 0.16666667, %v551_v52  ;;  %v704_v4 = vmul.f32 0.16666667, %v552_v62  ;;  %v705_v8 = vmul.f32 0.16666667, %v553_v63 }
  0x70   :  { %v854_v9 = vmul.f32 %v702_v6, %v1317_v21  ;;  %v706_v10 = vmul.f32 0.16666667, %v554_v7  ;;  %v707_v20 = vmul.f32 0.16666667, %v555_v11  ;;  %v708_v22 = vmul.f32 0.16666667, %v556_v13 }
  0x71   :  { %1005 = vst [vmem:[#allocation5 + $0x230] sm:$0xff] %v853_v14  ;;  %v855_v23 = vmul.f32 %v703_v15, %v1319_v29  ;;  %v856_v27 = vmul.f32 %v704_v4, %v1321_v17  ;;  %v857_v28 = vmul.f32 %v705_v8, %v1323_v34  ;;  %v253_v35 = vadd.f32 3.0, %v1335_v3  ;;  %v108_v18 = vld [vmem:[#allocation2 + $0x2a8] sm:$0xff]  ;;  %v1363_v59 = vld [vmem:[#allocation2 + $0x2d0] sm:$0xff]  ;;  %v114_v15 = vld [vmem:[#allocation2 + $0x2d8] sm:$0xff] }
  0x72   :  { %1006 = vst [vmem:[#allocation5 + $0x238] sm:$0xff] %v854_v9  ;;  %v858_v24 = vmul.f32 %v706_v10, %v98_v48  ;;  %v859_v25 = vmul.f32 %v707_v20, %v99_v31  ;;  %v860_v26 = vmul.f32 %v708_v22, %v100_v30  ;;  %v254_v21 = vadd.f32 3.0, %v1337_v5  ;;  %v115_v4 = vld [vmem:[#allocation2 + $0x2e0] sm:$0xff] }
  0x73   :  { %1007 = vst [vmem:[#allocation5 + $0x240] sm:$0xff] %v855_v23  ;;  %1008 = vst [vmem:[#allocation5 + $0x248] sm:$0xff] %v856_v27  ;;  %v405_v32 = vmax.f32 %v253_v35, 0.0  ;;  %v255_v29 = vadd.f32 3.0, %v1339_v16  ;;  %v256_v17 = vadd.f32 3.0, %v1341_v2  ;;  %v257_v34 = vadd.f32 3.0, %v1343_v12 }
  0x74   :  { %1009 = vst [vmem:[#allocation5 + $0x250] sm:$0xff] %v857_v28  ;;  %1010 = vst [vmem:[#allocation5 + $0x258] sm:$0xff] %v858_v24  ;;  %v406_v38 = vmax.f32 %v254_v21, 0.0  ;;  %v258_v39 = vadd.f32 3.0, %v106_v36  ;;  %v259_v43 = vadd.f32 3.0, %v107_v19  ;;  %v260_v44 = vadd.f32 3.0, %v108_v18 }
  0x75   :  { %1011 = vst [vmem:[#allocation5 + $0x260] sm:$0xff] %v859_v25  ;;  %1012 = vst [vmem:[#allocation5 + $0x268] sm:$0xff] %v860_v26  ;;  %v557_v47 = vmin.f32 %v405_v32, 6.0  ;;  %v407_v48 = vmax.f32 %v255_v29, 0.0  ;;  %v408_v31 = vmax.f32 %v256_v17, 0.0  ;;  %v409_v30 = vmax.f32 %v257_v34, 0.0 }
  0x76   :  { %v558_v40 = vmin.f32 %v406_v38, 6.0  ;;  %v410_v41 = vmax.f32 %v258_v39, 0.0  ;;  %v411_v42 = vmax.f32 %v259_v43, 0.0  ;;  %v412_v37 = vmax.f32 %v260_v44, 0.0  ;;  %v1375_v32 = vld [vmem:[#allocation2 + $0x2f0] sm:$0xff]  ;;  %v1377_v39 = vld [vmem:[#allocation2 + $0x2f8] sm:$0xff] }
  0x77   :  { %v709_v45 = vmul.f32 0.16666667, %v557_v47  ;;  %v559_v33 = vmin.f32 %v407_v48, 6.0  ;;  %v560_v46 = vmin.f32 %v408_v31, 6.0  ;;  %v561_v54 = vmin.f32 %v409_v30, 6.0  ;;  %v1379_v31 = vld [vmem:[#allocation2 + $0x300] sm:$0xff] }
  0x78   :  { %v710_v56 = vmul.f32 0.16666667, %v558_v40  ;;  %v562_v57 = vmin.f32 %v410_v41, 6.0  ;;  %v563_v0 = vmin.f32 %v411_v42, 6.0  ;;  %v564_v1 = vmin.f32 %v412_v37, 6.0  ;;  %v1381_v30 = vld [vmem:[#allocation2 + $0x308] sm:$0xff] }
  0x79   :  { %v861_v60 = vmul.f32 %v709_v45, %v1335_v3  ;;  %v711_v61 = vmul.f32 0.16666667, %v559_v33  ;;  %v712_v51 = vmul.f32 0.16666667, %v560_v46  ;;  %v713_v58 = vmul.f32 0.16666667, %v561_v54 }
  0x7a   :  { %v862_v52 = vmul.f32 %v710_v56, %v1337_v5  ;;  %v714_v62 = vmul.f32 0.16666667, %v562_v57  ;;  %v715_v63 = vmul.f32 0.16666667, %v563_v0  ;;  %v716_v6 = vmul.f32 0.16666667, %v564_v1 }
  0x7b   :  { %1013 = vst [vmem:[#allocation5 + $0x270] sm:$0xff] %v861_v60  ;;  %v863_v7 = vmul.f32 %v711_v61, %v1339_v16  ;;  %v864_v11 = vmul.f32 %v712_v51, %v1341_v2  ;;  %v865_v13 = vmul.f32 %v713_v58, %v1343_v12  ;;  %v261_v14 = vadd.f32 3.0, %v1355_v50  ;;  %v116_v3 = vld [vmem:[#allocation2 + $0x2e8] sm:$0xff]  ;;  %v1383_v40 = vld [vmem:[#allocation2 + $0x310] sm:$0xff]  ;;  %v122_v61 = vld [vmem:[#allocation2 + $0x318] sm:$0xff] }
  0x7c   :  { %1014 = vst [vmem:[#allocation5 + $0x278] sm:$0xff] %v862_v52  ;;  %v866_v8 = vmul.f32 %v714_v62, %v106_v36  ;;  %v867_v9 = vmul.f32 %v715_v63, %v107_v19  ;;  %v868_v10 = vmul.f32 %v716_v6, %v108_v18  ;;  %v262_v5 = vadd.f32 3.0, %v1357_v55  ;;  %v123_v51 = vld [vmem:[#allocation2 + $0x320] sm:$0xff] }
  0x7d   :  { %1015 = vst [vmem:[#allocation5 + $0x280] sm:$0xff] %v863_v7  ;;  %1016 = vst [vmem:[#allocation5 + $0x288] sm:$0xff] %v864_v11  ;;  %v413_v20 = vmax.f32 %v261_v14, 0.0  ;;  %v263_v16 = vadd.f32 3.0, %v1359_v53  ;;  %v264_v2 = vadd.f32 3.0, %v1361_v49  ;;  %v265_v12 = vadd.f32 3.0, %v1363_v59 }
  0x7e   :  { %1017 = vst [vmem:[#allocation5 + $0x290] sm:$0xff] %v865_v13  ;;  %1018 = vst [vmem:[#allocation5 + $0x298] sm:$0xff] %v866_v8  ;;  %v414_v22 = vmax.f32 %v262_v5, 0.0  ;;  %v266_v23 = vadd.f32 3.0, %v114_v15  ;;  %v267_v27 = vadd.f32 3.0, %v115_v4  ;;  %v268_v28 = vadd.f32 3.0, %v116_v3 }
  0x7f   :  { %1019 = vst [vmem:[#allocation5 + $0x2a0] sm:$0xff] %v867_v9  ;;  %1020 = vst [vmem:[#allocation5 + $0x2a8] sm:$0xff] %v868_v10  ;;  %v565_v35 = vmin.f32 %v413_v20, 6.0  ;;  %v415_v36 = vmax.f32 %v263_v16, 0.0  ;;  %v416_v19 = vmax.f32 %v264_v2, 0.0  ;;  %v417_v18 = vmax.f32 %v265_v12, 0.0 }
  0x80   :  { %v566_v24 = vmin.f32 %v414_v22, 6.0  ;;  %v418_v25 = vmax.f32 %v266_v23, 0.0  ;;  %v419_v26 = vmax.f32 %v267_v27, 0.0  ;;  %v420_v21 = vmax.f32 %v268_v28, 0.0  ;;  %v1395_v20 = vld [vmem:[#allocation2 + $0x330] sm:$0xff]  ;;  %v1397_v23 = vld [vmem:[#allocation2 + $0x338] sm:$0xff] }
  0x81   :  { %v717_v29 = vmul.f32 0.16666667, %v565_v35  ;;  %v567_v17 = vmin.f32 %v415_v36, 6.0  ;;  %v568_v34 = vmin.f32 %v416_v19, 6.0  ;;  %v569_v38 = vmin.f32 %v417_v18, 6.0  ;;  %v1399_v19 = vld [vmem:[#allocation2 + $0x340] sm:$0xff] }
  0x82   :  { %v718_v43 = vmul.f32 0.16666667, %v566_v24  ;;  %v570_v44 = vmin.f32 %v418_v25, 6.0  ;;  %v571_v47 = vmin.f32 %v419_v26, 6.0  ;;  %v572_v48 = vmin.f32 %v420_v21, 6.0  ;;  %v1401_v18 = vld [vmem:[#allocation2 + $0x348] sm:$0xff] }
  0x83   :  { %v869_v41 = vmul.f32 %v717_v29, %v1355_v50  ;;  %v719_v42 = vmul.f32 0.16666667, %v567_v17  ;;  %v720_v37 = vmul.f32 0.16666667, %v568_v34  ;;  %v721_v45 = vmul.f32 0.16666667, %v569_v38 }
  0x84   :  { %v870_v33 = vmul.f32 %v718_v43, %v1357_v55  ;;  %v722_v46 = vmul.f32 0.16666667, %v570_v44  ;;  %v723_v54 = vmul.f32 0.16666667, %v571_v47  ;;  %v724_v56 = vmul.f32 0.16666667, %v572_v48 }
  0x85   :  { %1021 = vst [vmem:[#allocation5 + $0x2b0] sm:$0xff] %v869_v41  ;;  %v871_v57 = vmul.f32 %v719_v42, %v1359_v53  ;;  %v872_v0 = vmul.f32 %v720_v37, %v1361_v49  ;;  %v873_v1 = vmul.f32 %v721_v45, %v1363_v59  ;;  %v269_v60 = vadd.f32 3.0, %v1375_v32  ;;  %v124_v50 = vld [vmem:[#allocation2 + $0x328] sm:$0xff]  ;;  %v1403_v24 = vld [vmem:[#allocation2 + $0x350] sm:$0xff]  ;;  %v130_v42 = vld [vmem:[#allocation2 + $0x358] sm:$0xff] }
  0x86   :  { %1022 = vst [vmem:[#allocation5 + $0x2b8] sm:$0xff] %v870_v33  ;;  %v874_v58 = vmul.f32 %v722_v46, %v114_v15  ;;  %v875_v52 = vmul.f32 %v723_v54, %v115_v4  ;;  %v876_v62 = vmul.f32 %v724_v56, %v116_v3  ;;  %v270_v55 = vadd.f32 3.0, %v1377_v39  ;;  %v131_v37 = vld [vmem:[#allocation2 + $0x360] sm:$0xff] }
  0x87   :  { %1023 = vst [vmem:[#allocation5 + $0x2c0] sm:$0xff] %v871_v57  ;;  %1024 = vst [vmem:[#allocation5 + $0x2c8] sm:$0xff] %v872_v0  ;;  %v421_v63 = vmax.f32 %v269_v60, 0.0  ;;  %v271_v53 = vadd.f32 3.0, %v1379_v31  ;;  %v272_v49 = vadd.f32 3.0, %v1381_v30  ;;  %v273_v59 = vadd.f32 3.0, %v1383_v40 }
  0x88   :  { %1025 = vst [vmem:[#allocation5 + $0x2d0] sm:$0xff] %v873_v1  ;;  %1026 = vst [vmem:[#allocation5 + $0x2d8] sm:$0xff] %v874_v58  ;;  %v422_v6 = vmax.f32 %v270_v55, 0.0  ;;  %v274_v7 = vadd.f32 3.0, %v122_v61  ;;  %v275_v11 = vadd.f32 3.0, %v123_v51  ;;  %v276_v13 = vadd.f32 3.0, %v124_v50 }
  0x89   :  { %1027 = vst [vmem:[#allocation5 + $0x2e0] sm:$0xff] %v875_v52  ;;  %1028 = vst [vmem:[#allocation5 + $0x2e8] sm:$0xff] %v876_v62  ;;  %v573_v14 = vmin.f32 %v421_v63, 6.0  ;;  %v423_v15 = vmax.f32 %v271_v53, 0.0  ;;  %v424_v4 = vmax.f32 %v272_v49, 0.0  ;;  %v425_v3 = vmax.f32 %v273_v59, 0.0 }
  0x8a   :  { %v574_v8 = vmin.f32 %v422_v6, 6.0  ;;  %v426_v9 = vmax.f32 %v274_v7, 0.0  ;;  %v427_v10 = vmax.f32 %v275_v11, 0.0  ;;  %v428_v5 = vmax.f32 %v276_v13, 0.0  ;;  %v1415_v63 = vld [vmem:[#allocation2 + $0x370] sm:$0xff]  ;;  %v1417_v7 = vld [vmem:[#allocation2 + $0x378] sm:$0xff] }
  0x8b   :  { %v725_v16 = vmul.f32 0.16666667, %v573_v14  ;;  %v575_v2 = vmin.f32 %v423_v15, 6.0  ;;  %v576_v12 = vmin.f32 %v424_v4, 6.0  ;;  %v577_v22 = vmin.f32 %v425_v3, 6.0  ;;  %v1419_v4 = vld [vmem:[#allocation2 + $0x380] sm:$0xff] }
  0x8c   :  { %v726_v27 = vmul.f32 0.16666667, %v574_v8  ;;  %v578_v28 = vmin.f32 %v426_v9, 6.0  ;;  %v579_v35 = vmin.f32 %v427_v10, 6.0  ;;  %v580_v36 = vmin.f32 %v428_v5, 6.0  ;;  %v1421_v3 = vld [vmem:[#allocation2 + $0x388] sm:$0xff] }
  0x8d   :  { %v877_v25 = vmul.f32 %v725_v16, %v1375_v32  ;;  %v727_v26 = vmul.f32 0.16666667, %v575_v2  ;;  %v728_v21 = vmul.f32 0.16666667, %v576_v12  ;;  %v729_v29 = vmul.f32 0.16666667, %v577_v22 }
  0x8e   :  { %v878_v17 = vmul.f32 %v726_v27, %v1377_v39  ;;  %v730_v34 = vmul.f32 0.16666667, %v578_v28  ;;  %v731_v38 = vmul.f32 0.16666667, %v579_v35  ;;  %v732_v43 = vmul.f32 0.16666667, %v580_v36 }
  0x8f   :  { %1029 = vst [vmem:[#allocation5 + $0x2f0] sm:$0xff] %v877_v25  ;;  %v879_v44 = vmul.f32 %v727_v26, %v1379_v31  ;;  %v880_v47 = vmul.f32 %v728_v21, %v1381_v30  ;;  %v881_v48 = vmul.f32 %v729_v29, %v1383_v40  ;;  %v277_v41 = vadd.f32 3.0, %v1395_v20  ;;  %v132_v32 = vld [vmem:[#allocation2 + $0x368] sm:$0xff]  ;;  %v1423_v8 = vld [vmem:[#allocation2 + $0x390] sm:$0xff]  ;;  %v138_v26 = vld [vmem:[#allocation2 + $0x398] sm:$0xff] }
  0x90   :  { %1030 = vst [vmem:[#allocation5 + $0x2f8] sm:$0xff] %v878_v17  ;;  %v882_v45 = vmul.f32 %v730_v34, %v122_v61  ;;  %v883_v33 = vmul.f32 %v731_v38, %v123_v51  ;;  %v884_v46 = vmul.f32 %v732_v43, %v124_v50  ;;  %v278_v39 = vadd.f32 3.0, %v1397_v23  ;;  %v139_v21 = vld [vmem:[#allocation2 + $0x3a0] sm:$0xff] }
  0x91   :  { %1031 = vst [vmem:[#allocation5 + $0x300] sm:$0xff] %v879_v44  ;;  %1032 = vst [vmem:[#allocation5 + $0x308] sm:$0xff] %v880_v47  ;;  %v429_v54 = vmax.f32 %v277_v41, 0.0  ;;  %v279_v31 = vadd.f32 3.0, %v1399_v19  ;;  %v280_v30 = vadd.f32 3.0, %v1401_v18  ;;  %v281_v40 = vadd.f32 3.0, %v1403_v24 }
  0x92   :  { %1033 = vst [vmem:[#allocation5 + $0x310] sm:$0xff] %v881_v48  ;;  %1034 = vst [vmem:[#allocation5 + $0x318] sm:$0xff] %v882_v45  ;;  %v430_v56 = vmax.f32 %v278_v39, 0.0  ;;  %v282_v57 = vadd.f32 3.0, %v130_v42  ;;  %v283_v0 = vadd.f32 3.0, %v131_v37  ;;  %v284_v1 = vadd.f32 3.0, %v132_v32 }
  0x93   :  { %1035 = vst [vmem:[#allocation5 + $0x320] sm:$0xff] %v883_v33  ;;  %1036 = vst [vmem:[#allocation5 + $0x328] sm:$0xff] %v884_v46  ;;  %v581_v60 = vmin.f32 %v429_v54, 6.0  ;;  %v431_v61 = vmax.f32 %v279_v31, 0.0  ;;  %v432_v51 = vmax.f32 %v280_v30, 0.0  ;;  %v433_v50 = vmax.f32 %v281_v40, 0.0 }
  0x94   :  { %v582_v58 = vmin.f32 %v430_v56, 6.0  ;;  %v434_v52 = vmax.f32 %v282_v57, 0.0  ;;  %v435_v62 = vmax.f32 %v283_v0, 0.0  ;;  %v436_v55 = vmax.f32 %v284_v1, 0.0  ;;  %v1435_v54 = vld [vmem:[#allocation2 + $0x3b0] sm:$0xff]  ;;  %v1437_v57 = vld [vmem:[#allocation2 + $0x3b8] sm:$0xff] }
  0x95   :  { %v733_v53 = vmul.f32 0.16666667, %v581_v60  ;;  %v583_v49 = vmin.f32 %v431_v61, 6.0  ;;  %v584_v59 = vmin.f32 %v432_v51, 6.0  ;;  %v585_v6 = vmin.f32 %v433_v50, 6.0  ;;  %v1439_v51 = vld [vmem:[#allocation2 + $0x3c0] sm:$0xff] }
  0x96   :  { %v734_v11 = vmul.f32 0.16666667, %v582_v58  ;;  %v586_v13 = vmin.f32 %v434_v52, 6.0  ;;  %v587_v14 = vmin.f32 %v435_v62, 6.0  ;;  %v588_v15 = vmin.f32 %v436_v55, 6.0  ;;  %v1441_v50 = vld [vmem:[#allocation2 + $0x3c8] sm:$0xff] }
  0x97   :  { %v885_v9 = vmul.f32 %v733_v53, %v1395_v20  ;;  %v735_v10 = vmul.f32 0.16666667, %v583_v49  ;;  %v736_v5 = vmul.f32 0.16666667, %v584_v59  ;;  %v737_v16 = vmul.f32 0.16666667, %v585_v6 }
  0x98   :  { %v886_v2 = vmul.f32 %v734_v11, %v1397_v23  ;;  %v738_v12 = vmul.f32 0.16666667, %v586_v13  ;;  %v739_v22 = vmul.f32 0.16666667, %v587_v14  ;;  %v740_v27 = vmul.f32 0.16666667, %v588_v15 }
  0x99   :  { %1037 = vst [vmem:[#allocation5 + $0x330] sm:$0xff] %v885_v9  ;;  %v887_v28 = vmul.f32 %v735_v10, %v1399_v19  ;;  %v888_v35 = vmul.f32 %v736_v5, %v1401_v18  ;;  %v889_v36 = vmul.f32 %v737_v16, %v1403_v24  ;;  %v285_v25 = vadd.f32 3.0, %v1415_v63  ;;  %v140_v20 = vld [vmem:[#allocation2 + $0x3a8] sm:$0xff]  ;;  %v1443_v58 = vld [vmem:[#allocation2 + $0x3d0] sm:$0xff]  ;;  %v146_v10 = vld [vmem:[#allocation2 + $0x3d8] sm:$0xff] }
  0x9a   :  { %1038 = vst [vmem:[#allocation5 + $0x338] sm:$0xff] %v886_v2  ;;  %v890_v29 = vmul.f32 %v738_v12, %v130_v42  ;;  %v891_v17 = vmul.f32 %v739_v22, %v131_v37  ;;  %v892_v34 = vmul.f32 %v740_v27, %v132_v32  ;;  %v286_v23 = vadd.f32 3.0, %v1417_v7  ;;  %v147_v5 = vld [vmem:[#allocation2 + $0x3e0] sm:$0xff] }
  0x9b   :  { %1039 = vst [vmem:[#allocation5 + $0x340] sm:$0xff] %v887_v28  ;;  %1040 = vst [vmem:[#allocation5 + $0x348] sm:$0xff] %v888_v35  ;;  %v437_v38 = vmax.f32 %v285_v25, 0.0  ;;  %v287_v19 = vadd.f32 3.0, %v1419_v4  ;;  %v288_v18 = vadd.f32 3.0, %v1421_v3  ;;  %v289_v24 = vadd.f32 3.0, %v1423_v8 }
  0x9c   :  { %1041 = vst [vmem:[#allocation5 + $0x350] sm:$0xff] %v889_v36  ;;  %1042 = vst [vmem:[#allocation5 + $0x358] sm:$0xff] %v890_v29  ;;  %v438_v43 = vmax.f32 %v286_v23, 0.0  ;;  %v290_v44 = vadd.f32 3.0, %v138_v26  ;;  %v291_v47 = vadd.f32 3.0, %v139_v21  ;;  %v292_v48 = vadd.f32 3.0, %v140_v20 }
  0x9d   :  { %1043 = vst [vmem:[#allocation5 + $0x360] sm:$0xff] %v891_v17  ;;  %1044 = vst [vmem:[#allocation5 + $0x368] sm:$0xff] %v892_v34  ;;  %v589_v41 = vmin.f32 %v437_v38, 6.0  ;;  %v439_v42 = vmax.f32 %v287_v19, 0.0  ;;  %v440_v37 = vmax.f32 %v288_v18, 0.0  ;;  %v441_v32 = vmax.f32 %v289_v24, 0.0 }
  0x9e   :  { %v590_v45 = vmin.f32 %v438_v43, 6.0  ;;  %v442_v33 = vmax.f32 %v290_v44, 0.0  ;;  %v443_v46 = vmax.f32 %v291_v47, 0.0  ;;  %v444_v39 = vmax.f32 %v292_v48, 0.0  ;;  %v1455_v38 = vld [vmem:[#allocation2 + $0x3f0] sm:$0xff]  ;;  %v1457_v44 = vld [vmem:[#allocation2 + $0x3f8] sm:$0xff] }
  0x9f   :  { %v741_v31 = vmul.f32 0.16666667, %v589_v41  ;;  %v591_v30 = vmin.f32 %v439_v42, 6.0  ;;  %v592_v40 = vmin.f32 %v440_v37, 6.0  ;;  %v593_v56 = vmin.f32 %v441_v32, 6.0  ;;  %v1459_v37 = vld [vmem:[#allocation2 + $0x400] sm:$0xff] }
  0xa0   :  { %v742_v0 = vmul.f32 0.16666667, %v590_v45  ;;  %v594_v1 = vmin.f32 %v442_v33, 6.0  ;;  %v595_v60 = vmin.f32 %v443_v46, 6.0  ;;  %v596_v61 = vmin.f32 %v444_v39, 6.0  ;;  %v1461_v32 = vld [vmem:[#allocation2 + $0x408] sm:$0xff] }
  0xa1   :  { %v893_v52 = vmul.f32 %v741_v31, %v1415_v63  ;;  %v743_v62 = vmul.f32 0.16666667, %v591_v30  ;;  %v744_v55 = vmul.f32 0.16666667, %v592_v40  ;;  %v745_v53 = vmul.f32 0.16666667, %v593_v56 }
  0xa2   :  { %v894_v49 = vmul.f32 %v742_v0, %v1417_v7  ;;  %v746_v59 = vmul.f32 0.16666667, %v594_v1  ;;  %v747_v6 = vmul.f32 0.16666667, %v595_v60  ;;  %v748_v11 = vmul.f32 0.16666667, %v596_v61 }
  0xa3   :  { %1045 = vst [vmem:[#allocation5 + $0x370] sm:$0xff] %v893_v52  ;;  %v895_v13 = vmul.f32 %v743_v62, %v1419_v4  ;;  %v896_v14 = vmul.f32 %v744_v55, %v1421_v3  ;;  %v897_v15 = vmul.f32 %v745_v53, %v1423_v8  ;;  %v293_v9 = vadd.f32 3.0, %v1435_v54  ;;  %v148_v63 = vld [vmem:[#allocation2 + $0x3e8] sm:$0xff]  ;;  %v1463_v45 = vld [vmem:[#allocation2 + $0x410] sm:$0xff]  ;;  %v154_v62 = vld [vmem:[#allocation2 + $0x418] sm:$0xff] }
  0xa4   :  { %1046 = vst [vmem:[#allocation5 + $0x378] sm:$0xff] %v894_v49  ;;  %v898_v16 = vmul.f32 %v746_v59, %v138_v26  ;;  %v899_v2 = vmul.f32 %v747_v6, %v139_v21  ;;  %v900_v12 = vmul.f32 %v748_v11, %v140_v20  ;;  %v294_v7 = vadd.f32 3.0, %v1437_v57  ;;  %v155_v55 = vld [vmem:[#allocation2 + $0x420] sm:$0xff] }
  0xa5   :  { %1047 = vst [vmem:[#allocation5 + $0x380] sm:$0xff] %v895_v13  ;;  %1048 = vst [vmem:[#allocation5 + $0x388] sm:$0xff] %v896_v14  ;;  %v445_v22 = vmax.f32 %v293_v9, 0.0  ;;  %v295_v4 = vadd.f32 3.0, %v1439_v51  ;;  %v296_v3 = vadd.f32 3.0, %v1441_v50  ;;  %v297_v8 = vadd.f32 3.0, %v1443_v58 }
  0xa6   :  { %1049 = vst [vmem:[#allocation5 + $0x390] sm:$0xff] %v897_v15  ;;  %1050 = vst [vmem:[#allocation5 + $0x398] sm:$0xff] %v898_v16  ;;  %v446_v27 = vmax.f32 %v294_v7, 0.0  ;;  %v298_v28 = vadd.f32 3.0, %v146_v10  ;;  %v299_v35 = vadd.f32 3.0, %v147_v5  ;;  %v300_v36 = vadd.f32 3.0, %v148_v63 }
  0xa7   :  { %1051 = vst [vmem:[#allocation5 + $0x3a0] sm:$0xff] %v899_v2  ;;  %1052 = vst [vmem:[#allocation5 + $0x3a8] sm:$0xff] %v900_v12  ;;  %v597_v25 = vmin.f32 %v445_v22, 6.0  ;;  %v447_v26 = vmax.f32 %v295_v4, 0.0  ;;  %v448_v21 = vmax.f32 %v296_v3, 0.0  ;;  %v449_v20 = vmax.f32 %v297_v8, 0.0 }
  0xa8   :  { %v598_v29 = vmin.f32 %v446_v27, 6.0  ;;  %v450_v17 = vmax.f32 %v298_v28, 0.0  ;;  %v451_v34 = vmax.f32 %v299_v35, 0.0  ;;  %v452_v23 = vmax.f32 %v300_v36, 0.0  ;;  %v1475_v22 = vld [vmem:[#allocation2 + $0x430] sm:$0xff]  ;;  %v1477_v28 = vld [vmem:[#allocation2 + $0x438] sm:$0xff] }
  0xa9   :  { %v749_v19 = vmul.f32 0.16666667, %v597_v25  ;;  %v599_v18 = vmin.f32 %v447_v26, 6.0  ;;  %v600_v24 = vmin.f32 %v448_v21, 6.0  ;;  %v601_v43 = vmin.f32 %v449_v20, 6.0  ;;  %v1479_v21 = vld [vmem:[#allocation2 + $0x440] sm:$0xff] }
  0xaa   :  { %v750_v47 = vmul.f32 0.16666667, %v598_v29  ;;  %v602_v48 = vmin.f32 %v450_v17, 6.0  ;;  %v603_v41 = vmin.f32 %v451_v34, 6.0  ;;  %v604_v42 = vmin.f32 %v452_v23, 6.0  ;;  %v1481_v20 = vld [vmem:[#allocation2 + $0x448] sm:$0xff] }
  0xab   :  { %v901_v33 = vmul.f32 %v749_v19, %v1435_v54  ;;  %v751_v46 = vmul.f32 0.16666667, %v599_v18  ;;  %v752_v39 = vmul.f32 0.16666667, %v600_v24  ;;  %v753_v31 = vmul.f32 0.16666667, %v601_v43 }
  0xac   :  { %v902_v30 = vmul.f32 %v750_v47, %v1437_v57  ;;  %v754_v40 = vmul.f32 0.16666667, %v602_v48  ;;  %v755_v56 = vmul.f32 0.16666667, %v603_v41  ;;  %v756_v0 = vmul.f32 0.16666667, %v604_v42 }
  0xad   :  { %1053 = vst [vmem:[#allocation5 + $0x3b0] sm:$0xff] %v901_v33  ;;  %v903_v1 = vmul.f32 %v751_v46, %v1439_v51  ;;  %v904_v60 = vmul.f32 %v752_v39, %v1441_v50  ;;  %v905_v61 = vmul.f32 %v753_v31, %v1443_v58  ;;  %v301_v52 = vadd.f32 3.0, %v1455_v38  ;;  %v156_v54 = vld [vmem:[#allocation2 + $0x428] sm:$0xff]  ;;  %v1483_v29 = vld [vmem:[#allocation2 + $0x450] sm:$0xff]  ;;  %v162_v46 = vld [vmem:[#allocation2 + $0x458] sm:$0xff] }
  0xae   :  { %1054 = vst [vmem:[#allocation5 + $0x3b8] sm:$0xff] %v902_v30  ;;  %v906_v53 = vmul.f32 %v754_v40, %v146_v10  ;;  %v907_v49 = vmul.f32 %v755_v56, %v147_v5  ;;  %v908_v59 = vmul.f32 %v756_v0, %v148_v63  ;;  %v302_v57 = vadd.f32 3.0, %v1457_v44  ;;  %v163_v39 = vld [vmem:[#allocation2 + $0x460] sm:$0xff] }
  0xaf   :  { %1055 = vst [vmem:[#allocation5 + $0x3c0] sm:$0xff] %v903_v1  ;;  %1056 = vst [vmem:[#allocation5 + $0x3c8] sm:$0xff] %v904_v60  ;;  %v453_v6 = vmax.f32 %v301_v52, 0.0  ;;  %v303_v51 = vadd.f32 3.0, %v1459_v37  ;;  %v304_v50 = vadd.f32 3.0, %v1461_v32  ;;  %v305_v58 = vadd.f32 3.0, %v1463_v45 }
  0xb0   :  { %1057 = vst [vmem:[#allocation5 + $0x3d0] sm:$0xff] %v905_v61  ;;  %1058 = vst [vmem:[#allocation5 + $0x3d8] sm:$0xff] %v906_v53  ;;  %v454_v11 = vmax.f32 %v302_v57, 0.0  ;;  %v306_v13 = vadd.f32 3.0, %v154_v62  ;;  %v307_v14 = vadd.f32 3.0, %v155_v55  ;;  %v308_v15 = vadd.f32 3.0, %v156_v54 }
  0xb1   :  { %1059 = vst [vmem:[#allocation5 + $0x3e0] sm:$0xff] %v907_v49  ;;  %1060 = vst [vmem:[#allocation5 + $0x3e8] sm:$0xff] %v908_v59  ;;  %v605_v9 = vmin.f32 %v453_v6, 6.0  ;;  %v455_v10 = vmax.f32 %v303_v51, 0.0  ;;  %v456_v5 = vmax.f32 %v304_v50, 0.0  ;;  %v457_v63 = vmax.f32 %v305_v58, 0.0 }
  0xb2   :  { %v606_v16 = vmin.f32 %v454_v11, 6.0  ;;  %v458_v2 = vmax.f32 %v306_v13, 0.0  ;;  %v459_v12 = vmax.f32 %v307_v14, 0.0  ;;  %v460_v7 = vmax.f32 %v308_v15, 0.0  ;;  %v165_v11 = vld [vmem:[#allocation2 + $0x470] sm:$0xff] }
  0xb3   :  { %v757_v4 = vmul.f32 0.16666667, %v605_v9  ;;  %v607_v3 = vmin.f32 %v455_v10, 6.0  ;;  %v608_v8 = vmin.f32 %v456_v5, 6.0  ;;  %v609_v27 = vmin.f32 %v457_v63, 6.0  ;;  %v166_v10 = vld [vmem:[#allocation2 + $0x478] sm:$0xff] }
  0xb4   :  { %v758_v35 = vmul.f32 0.16666667, %v606_v16  ;;  %v610_v36 = vmin.f32 %v458_v2, 6.0  ;;  %v611_v25 = vmin.f32 %v459_v12, 6.0  ;;  %v612_v26 = vmin.f32 %v460_v7, 6.0 }
  0xb5   :  { %v909_v17 = vmul.f32 %v757_v4, %v1455_v38  ;;  %v759_v34 = vmul.f32 0.16666667, %v607_v3  ;;  %v760_v23 = vmul.f32 0.16666667, %v608_v8  ;;  %v761_v19 = vmul.f32 0.16666667, %v609_v27 }
  0xb6   :  { %v910_v18 = vmul.f32 %v758_v35, %v1457_v44  ;;  %v762_v24 = vmul.f32 0.16666667, %v610_v36  ;;  %v763_v43 = vmul.f32 0.16666667, %v611_v25  ;;  %v764_v47 = vmul.f32 0.16666667, %v612_v26 }
  0xb7   :  { %1061 = vst [vmem:[#allocation5 + $0x3f0] sm:$0xff] %v909_v17  ;;  %v911_v48 = vmul.f32 %v759_v34, %v1459_v37  ;;  %v912_v41 = vmul.f32 %v760_v23, %v1461_v32  ;;  %v913_v42 = vmul.f32 %v761_v19, %v1463_v45  ;;  %v309_v33 = vadd.f32 3.0, %v1475_v22  ;;  %v164_v38 = vld [vmem:[#allocation2 + $0x468] sm:$0xff]  ;;  %v1495_v5 = vld [vmem:[#allocation2 + $0x480] sm:$0x7] }
  0xb8   :  { %1062 = vst [vmem:[#allocation5 + $0x3f8] sm:$0xff] %v910_v18  ;;  %v914_v31 = vmul.f32 %v762_v24, %v154_v62  ;;  %v915_v30 = vmul.f32 %v763_v43, %v155_v55  ;;  %v916_v40 = vmul.f32 %v764_v47, %v156_v54  ;;  %v310_v44 = vadd.f32 3.0, %v1477_v28  ;;  %v1497_v63 = vld [vmem:[#allocation2 + $0x488] sm:$0x7]  ;;  %v1499_v16 = vld [vmem:[#allocation2 + $0x490] sm:$0x7] }
  0xb9   :  { %1063 = vst [vmem:[#allocation5 + $0x400] sm:$0xff] %v911_v48  ;;  %1064 = vst [vmem:[#allocation5 + $0x408] sm:$0xff] %v912_v41  ;;  %v461_v56 = vmax.f32 %v309_v33, 0.0  ;;  %v311_v37 = vadd.f32 3.0, %v1479_v21  ;;  %v312_v32 = vadd.f32 3.0, %v1481_v20  ;;  %v313_v45 = vadd.f32 3.0, %v1483_v29 }
  0xba   :  { %1065 = vst [vmem:[#allocation5 + $0x410] sm:$0xff] %v913_v42  ;;  %1066 = vst [vmem:[#allocation5 + $0x418] sm:$0xff] %v914_v31  ;;  %v462_v0 = vmax.f32 %v310_v44, 0.0  ;;  %v314_v1 = vadd.f32 3.0, %v162_v46  ;;  %v315_v60 = vadd.f32 3.0, %v163_v39  ;;  %v316_v61 = vadd.f32 3.0, %v164_v38 }
  0xbb   :  { %1067 = vst [vmem:[#allocation5 + $0x420] sm:$0xff] %v915_v30  ;;  %1068 = vst [vmem:[#allocation5 + $0x428] sm:$0xff] %v916_v40  ;;  %v613_v52 = vmin.f32 %v461_v56, 6.0  ;;  %v463_v62 = vmax.f32 %v311_v37, 0.0  ;;  %v464_v55 = vmax.f32 %v312_v32, 0.0  ;;  %v465_v54 = vmax.f32 %v313_v45, 0.0 }
  0xbc   :  { %v614_v53 = vmin.f32 %v462_v0, 6.0  ;;  %v466_v49 = vmax.f32 %v314_v1, 0.0  ;;  %v467_v59 = vmax.f32 %v315_v60, 0.0  ;;  %v468_v57 = vmax.f32 %v316_v61, 0.0  ;;  %v1502_v3 = vld [vmem:[#allocation2 + $0x498] sm:$0x7] }
  0xbd   :  { %v765_v6 = vmul.f32 0.16666667, %v613_v52  ;;  %v615_v51 = vmin.f32 %v463_v62, 6.0  ;;  %v616_v50 = vmin.f32 %v464_v55, 6.0  ;;  %v617_v58 = vmin.f32 %v465_v54, 6.0 }
  0xbe   :  { %v766_v13 = vmul.f32 0.16666667, %v614_v53  ;;  %v618_v14 = vmin.f32 %v466_v49, 6.0  ;;  %v619_v15 = vmin.f32 %v467_v59, 6.0  ;;  %v620_v9 = vmin.f32 %v468_v57, 6.0 }
  0xbf   :  { %v917_v2 = vmul.f32 %v765_v6, %v1475_v22  ;;  %v767_v12 = vmul.f32 0.16666667, %v615_v51  ;;  %v768_v7 = vmul.f32 0.16666667, %v616_v50  ;;  %v769_v4 = vmul.f32 0.16666667, %v617_v58 }
  0xc0   :  { %v918_v8 = vmul.f32 %v766_v13, %v1477_v28  ;;  %v770_v27 = vmul.f32 0.16666667, %v618_v14  ;;  %v771_v35 = vmul.f32 0.16666667, %v619_v15  ;;  %v772_v36 = vmul.f32 0.16666667, %v620_v9 }
  0xc1   :  { %1069 = vst [vmem:[#allocation5 + $0x430] sm:$0xff] %v917_v2  ;;  %v919_v25 = vmul.f32 %v767_v12, %v1479_v21  ;;  %v920_v26 = vmul.f32 %v768_v7, %v1481_v20  ;;  %v921_v17 = vmul.f32 %v769_v4, %v1483_v29  ;;  %v317_v34 = vadd.f32 3.0, %v165_v11  ;;  %v171_v23 = vld [vmem:[#allocation2 + $0x4a0] sm:$0x7]  ;;  %v172_v22 = vld [vmem:[#allocation2 + $0x4a8] sm:$0x7] }
  0xc2   :  { %1070 = vst [vmem:[#allocation5 + $0x438] sm:$0xff] %v918_v8  ;;  %v922_v19 = vmul.f32 %v770_v27, %v162_v46  ;;  %v923_v18 = vmul.f32 %v771_v35, %v163_v39  ;;  %v924_v24 = vmul.f32 %v772_v36, %v164_v38  ;;  %v318_v43 = vadd.f32 3.0, %v166_v10  ;;  %v173_v56 = vld [vmem:[#allocation2 + $0x4b0] sm:$0x7]  ;;  %v174_v1 = vld [vmem:[#allocation2 + $0x4b8] sm:$0x7] }
  0xc3   :  { %1071 = vst [vmem:[#allocation5 + $0x440] sm:$0xff] %v919_v25  ;;  %1072 = vst [vmem:[#allocation5 + $0x448] sm:$0xff] %v920_v26  ;;  %v469_v28 = vmax.f32 %v317_v34, 0.0  ;;  %v319_v47 = vadd.f32 3.0, %v1495_v5  ;;  %v320_v21 = vadd.f32 3.0, %v1497_v63  ;;  %v321_v20 = vadd.f32 3.0, %v1499_v16 }
  0xc4   :  { %1073 = vst [vmem:[#allocation5 + $0x450] sm:$0xff] %v921_v17  ;;  %1074 = vst [vmem:[#allocation5 + $0x458] sm:$0xff] %v922_v19  ;;  %v470_v29 = vmax.f32 %v318_v43, 0.0  ;;  %v322_v48 = vadd.f32 3.0, %v1502_v3  ;;  %v323_v41 = vadd.f32 3.0, %v171_v23  ;;  %v324_v42 = vadd.f32 3.0, %v172_v22 }
  0xc5   :  { %1075 = vst [vmem:[#allocation5 + $0x460] sm:$0xff] %v923_v18  ;;  %1076 = vst [vmem:[#allocation5 + $0x468] sm:$0xff] %v924_v24  ;;  %v621_v33 = vmin.f32 %v469_v28, 6.0  ;;  %v471_v46 = vmax.f32 %v319_v47, 0.0  ;;  %v472_v39 = vmax.f32 %v320_v21, 0.0  ;;  %v473_v38 = vmax.f32 %v321_v20, 0.0 }
  0xc6   :  { %v622_v31 = vmin.f32 %v470_v29, 6.0  ;;  %v474_v30 = vmax.f32 %v322_v48, 0.0  ;;  %v475_v40 = vmax.f32 %v323_v41, 0.0  ;;  %v476_v44 = vmax.f32 %v324_v42, 0.0 }
  0xc7   :  { %v773_v37 = vmul.f32 0.16666667, %v621_v33  ;;  %v623_v32 = vmin.f32 %v471_v46, 6.0  ;;  %v624_v45 = vmin.f32 %v472_v39, 6.0  ;;  %v625_v0 = vmin.f32 %v473_v38, 6.0 }
  0xc8   :  { %v774_v60 = vmul.f32 0.16666667, %v622_v31  ;;  %v626_v61 = vmin.f32 %v474_v30, 6.0  ;;  %v627_v52 = vmin.f32 %v475_v40, 6.0  ;;  %v628_v62 = vmin.f32 %v476_v44, 6.0 }
  0xc9   :  { %v925_v55 = vmul.f32 %v773_v37, %v165_v11  ;;  %v775_v54 = vmul.f32 0.16666667, %v623_v32  ;;  %v776_v53 = vmul.f32 0.16666667, %v624_v45  ;;  %v777_v49 = vmul.f32 0.16666667, %v625_v0 }
  0xca   :  { %v926_v59 = vmul.f32 %v774_v60, %v166_v10  ;;  %v778_v57 = vmul.f32 0.16666667, %v626_v61  ;;  %v779_v6 = vmul.f32 0.16666667, %v627_v52  ;;  %v780_v51 = vmul.f32 0.16666667, %v628_v62 }
  0xcb   :  { %1077 = vst [vmem:[#allocation5 + $0x470] sm:$0xff] %v925_v55  ;;  %v927_v50 = vmul.f32 %v775_v54, %v1495_v5  ;;  %v928_v58 = vmul.f32 %v776_v53, %v1497_v63  ;;  %v929_v13 = vmul.f32 %v777_v49, %v1499_v16  ;;  %v325_v14 = vadd.f32 3.0, %v173_v56 }
  0xcc   :  { %1078 = vst [vmem:[#allocation5 + $0x478] sm:$0xff] %v926_v59  ;;  %v930_v15 = vmul.f32 %v778_v57, %v1502_v3  ;;  %v931_v9 = vmul.f32 %v779_v6, %v171_v23  ;;  %v932_v11 = vmul.f32 %v780_v51, %v172_v22  ;;  %v326_v2 = vadd.f32 3.0, %v174_v1 }
  0xcd   :  { %1079 = vst [vmem:[#allocation5 + $0x480] sm:$0x7] %v927_v50  ;;  %1080 = vst [vmem:[#allocation5 + $0x488] sm:$0x7] %v928_v58  ;;  %v477_v10 = vmax.f32 %v325_v14, 0.0 }
  0xce   :  { %1081 = vst [vmem:[#allocation5 + $0x490] sm:$0x7] %v929_v13  ;;  %1082 = vst [vmem:[#allocation5 + $0x498] sm:$0x7] %v930_v15  ;;  %v478_v12 = vmax.f32 %v326_v2, 0.0 }
  0xcf   :  { %1083 = vst [vmem:[#allocation5 + $0x4a0] sm:$0x7] %v931_v9  ;;  %1084 = vst [vmem:[#allocation5 + $0x4a8] sm:$0x7] %v932_v11  ;;  %v629_v5 = vmin.f32 %v477_v10, 6.0 }
  0xd0   :  { %v630_v7 = vmin.f32 %v478_v12, 6.0 }
  0xd1   :  { %v781_v63 = vmul.f32 0.16666667, %v629_v5 }
  0xd2   :  { %v782_v16 = vmul.f32 0.16666667, %v630_v7 }
  0xd3   :  { %v933_v4 = vmul.f32 %v781_v63, %v173_v56 }
  0xd4   :  { %v934_v8 = vmul.f32 %v782_v16, %v174_v1 }
  0xd5   :  { %1085 = vst [vmem:[#allocation5 + $0x4b0] sm:$0x7] %v933_v4 }
  0xd6   :  { %1086 = vst [vmem:[#allocation5 + $0x4b8] sm:$0x7] %v934_v8 }
  0xd7   :  { %1139 = shalt.err (!%p1136_p9)
}
  0xd8   :  { %1098 = dma.vmem_to_hbm [thread:$0]  %s1093_s13, 19456, %s1523_s1, [#allocation4], %s1153_s9, %s1153_s9, %s1154_s10  }
  0xd9   :  { %1150 = dma.done.wait [#allocation4], 19456  }
  0xda   :  { %1151 = vsyncadd [#allocation4], 4294947840 }
  0xdb   :  { %1102 = vsyncpa [#allocation3], 1 }
  0xdc   :  { %1103 = vsyncpa [#allocation4], 1 }

</bundles_post_ra>
